<compile_context>
chip_gen: v7x
topology: tpu7x:2x2x1
jax: 0.10.0
libtpu: 0.0.40
codegen_flags: <defaults>
</compile_context>

<pallas_src>
import jax
import jax.numpy as jnp
from jax.experimental import pallas as pl
from jax.experimental.pallas import tpu as pltpu


def _round_up(x, m):
    return (x + m - 1) // m * m


def _sage_kernel(feat_ref, adj_ref, p_ref, w_self_ref, out_ref, acc_ref, deg_ref):
    # feat_ref   : (tile_n, F_in)    row tile of node features (self path)
    # adj_ref    : (tile_n, tile_k)  adjacency block (bf16), rows i, cols k
    # p_ref      : (tile_k, F_pad)   K-tile of P = X @ W_neigh (f32)
    # w_self_ref : (F_in, F_pad)     resident self-projection weight
    # out_ref    : (tile_n, F_pad)   output tile (resident across K)
    # acc_ref    : (tile_n, F_pad)   f32 accumulator for adj @ P
    # deg_ref    : (tile_n, 1)       f32 accumulator for row degrees
    k = pl.program_id(1)

    @pl.when(k == 0)
    def _():
        acc_ref[...] = jnp.zeros_like(acc_ref)
        deg_ref[...] = jnp.zeros_like(deg_ref)

    adj = adj_ref[...].astype(jnp.float32)  # bf16 HBM stream -> f32 compute

    # Accumulate projected neighbor aggregation:  adj @ (X @ W_neigh)
    acc_ref[...] += jnp.dot(adj, p_ref[...], preferred_element_type=jnp.float32)
    # Accumulate row degrees (adj.sum(dim=1)) across K tiles.
    deg_ref[...] += jnp.sum(adj, axis=1, keepdims=True)

    @pl.when(k == pl.num_programs(1) - 1)
    def _():
        inv_deg = pl.reciprocal(deg_ref[...] + 1.0, approx=True)
        neigh = acc_ref[...] * inv_deg
        out = neigh + jnp.dot(
            feat_ref[...], w_self_ref[...], preferred_element_type=jnp.float32
        )
        out_ref[...] = out.astype(out_ref.dtype)


def sage_conv(features, adj, weight, *, tile_n=256, tile_k=1024):
    """features: [N, F_in], adj: [N, N] dense, weight: [F_out, 2*F_in]."""
    N, F_in = features.shape
    F_out = weight.shape[0]
    assert weight.shape[1] == 2 * F_in

    tile_n = min(tile_n, N)
    tile_k = min(tile_k, N)
    assert N % tile_n == 0 and N % tile_k == 0

    f32 = jnp.float32
    feats = features.astype(f32)

    # Split the linear weight: proj([x, n]) = x @ W[:, :F_in].T + n @ W[:, F_in:].T
    w_self = weight[:, :F_in].astype(f32).T    # (F_in, F_out)
    w_neigh = weight[:, F_in:].astype(f32).T   # (F_in, F_out)

    # Pad the output feature dim to a lane-dense multiple of 128.
    F_pad = _round_up(F_out, 128)
    pad = F_pad - F_out
    if pad:
        w_self = jnp.pad(w_self, ((0, 0), (0, pad)))
        w_neigh = jnp.pad(w_neigh, ((0, 0), (0, pad)))

    # Associativity rewrite: precompute P = X @ W_neigh once (tiny matmul).
    p = jnp.dot(feats, w_neigh)                # (N, F_pad)

    # Stream adjacency as bf16 (0/1 values are exact in bf16): halves HBM bytes.
    adj_bf16 = adj.astype(jnp.bfloat16)

    grid = (N // tile_n, N // tile_k)
    out_padded = pl.pallas_call(
        _sage_kernel,
        out_shape=jax.ShapeDtypeStruct((N, F_pad), features.dtype),
        grid_spec=pltpu.PrefetchScalarGridSpec(
            num_scalar_prefetch=0,
            grid=grid,
            in_specs=[
                pl.BlockSpec((tile_n, F_in), lambda i, k: (i, 0)),    # feature rows
                pl.BlockSpec((tile_n, tile_k), lambda i, k: (i, k)),  # adj block
                pl.BlockSpec((tile_k, F_pad), lambda i, k: (k, 0)),   # P K-tile
                pl.BlockSpec((F_in, F_pad), lambda i, k: (0, 0)),     # W_self (resident)
            ],
            out_specs=pl.BlockSpec((tile_n, F_pad), lambda i, k: (i, 0)),
            scratch_shapes=[
                pltpu.VMEM((tile_n, F_pad), jnp.float32),  # adj @ P accumulator
                pltpu.VMEM((tile_n, 1), jnp.float32),      # degree accumulator
            ],
        ),
        compiler_params=pltpu.CompilerParams(
            dimension_semantics=("parallel", "arbitrary"),
        ),
    )(feats, adj_bf16, p, w_self)

    return out_padded[:, :F_out]


def sage_conv_ref(features, adj, weight):
    neigh = (adj @ features) / (jnp.sum(adj, axis=1, keepdims=True) + 1.0)
    data = jnp.concatenate([features, neigh], axis=-1)
    return data @ weight.T


if __name__ == "__main__":
    key = jax.random.PRNGKey(0)
    k_feat, k_adj, k_w = jax.random.split(key, 3)

    N, F_in, F_out = 512, 32, 64

    features = jax.random.normal(k_feat, (N, F_in), dtype=jnp.float32)
    # Random 0/1 dense adjacency, ~5% density.
    adj = (jax.random.uniform(k_adj, (N, N)) < 0.05).astype(jnp.float32)
    # nn.init.normal_ on proj.weight (bias=False): standard normal, [F_out, 2*F_in]
    weight = jax.random.normal(k_w, (F_out, 2 * F_in), dtype=jnp.float32)

    # Small tiles here so the K-accumulation path (grid = (2, 2)) is exercised.
    out = sage_conv(features, adj, weight, tile_n=256, tile_k=256)
    out = jax.block_until_ready(out)

    ref = sage_conv_ref(features, adj, weight)
    assert out.shape == (N, F_out)
    # Tolerance loosened slightly for the EUP approximate reciprocal.
    assert jnp.allclose(out, ref, atol=2e-2, rtol=2e-2)

    print("KERNEL_OK")
</pallas_src>

<mosaic_0001>
module attributes {stable_mosaic.version = 11 : i64} {
  func.func @_sage_kernel(%arg0: i32, %arg1: i32, %arg2: memref<256x32xf32, #tpu.memory_space<vmem>>, %arg3: memref<256x256xbf16, #tpu.memory_space<vmem>>, %arg4: memref<256x128xf32, #tpu.memory_space<vmem>>, %arg5: memref<32x128xf32, #tpu.memory_space<vmem>>, %arg6: memref<256x128xf32, #tpu.memory_space<vmem>>, %arg7: memref<256x128xf32, #tpu.memory_space<vmem>>, %arg8: memref<256x1xf32, #tpu.memory_space<vmem>>) attributes {dimension_semantics = [#tpu.dimension_semantics<parallel>, #tpu.dimension_semantics<arbitrary>], iteration_bounds = array<i64: 2, 2>, scalar_prefetch = 0 : i64, scratch_operands = 2 : i64, tpu.core_type = #tpu.core_type<tc>, window_params = [{transform_indices = @transform_0, window_bounds = array<i64: 256, 32>}, {transform_indices = @transform_1, window_bounds = array<i64: 256, 256>}, {transform_indices = @transform_2, window_bounds = array<i64: 256, 128>}, {pipeline_mode = #tpu.pipeline_mode<synchronous>, transform_indices = @transform_3, window_bounds = array<i64: 32, 128>}, {transform_indices = @transform_4, window_bounds = array<i64: 256, 128>}]} {
    %c0_i32 = arith.constant 0 : i32
    %0 = arith.cmpi eq, %arg1, %c0_i32 : i32
    %1 = arith.extui %0 : i1 to i32
    %c0_i32_0 = arith.constant 0 : i32
    %2 = arith.cmpi ne, %1, %c0_i32_0 : i32
    scf.if %2 {
      %cst_14 = arith.constant 0.000000e+00 : f32
      %18 = vector.broadcast %cst_14 : f32 to vector<256x128xf32>
      %c0_15 = arith.constant 0 : index
      %c0_16 = arith.constant 0 : index
      %19 = vector.load %arg7[%c0_15, %c0_16] : memref<256x128xf32, #tpu.memory_space<vmem>>, vector<256x128xf32>
      tpu.vector_store %arg7[%c0_15, %c0_16], %18 {strides = array<i32>} : memref<256x128xf32, #tpu.memory_space<vmem>>, vector<256x128xf32>,
      %cst_17 = arith.constant 0.000000e+00 : f32
      %20 = vector.broadcast %cst_17 : f32 to vector<256x1xf32>
      %c0_18 = arith.constant 0 : index
      %c0_19 = arith.constant 0 : index
      %21 = vector.load %arg8[%c0_18, %c0_19] : memref<256x1xf32, #tpu.memory_space<vmem>>, vector<256x1xf32>
      tpu.vector_store %arg8[%c0_18, %c0_19], %20 {strides = array<i32>} : memref<256x1xf32, #tpu.memory_space<vmem>>, vector<256x1xf32>,
    } else {
    }
    %c0 = arith.constant 0 : index
    %c0_1 = arith.constant 0 : index
    %3 = vector.load %arg3[%c0, %c0_1] : memref<256x256xbf16, #tpu.memory_space<vmem>>, vector<256x256xbf16>
    %4 = arith.extf %3 : vector<256x256xbf16> to vector<256x256xf32>
    %c0_2 = arith.constant 0 : index
    %c0_3 = arith.constant 0 : index
    %5 = vector.load %arg7[%c0_2, %c0_3] : memref<256x128xf32, #tpu.memory_space<vmem>>, vector<256x128xf32>
    %c0_4 = arith.constant 0 : index
    %c0_5 = arith.constant 0 : index
    %6 = vector.load %arg4[%c0_4, %c0_5] : memref<256x128xf32, #tpu.memory_space<vmem>>, vector<256x128xf32>
    %cst = arith.constant dense<0.000000e+00> : vector<256x128xf32>
    %7 = tpu.matmul %4, %6, %cst {dimension_numbers = #tpu.dot_dimension_numbers<[1], [0], [0], [1], [0, 0, 1, 1], [], []>} : vector<256x256xf32>, vector<256x128xf32>, vector<256x128xf32> -> vector<256x128xf32>
    %8 = arith.addf %5, %7 : vector<256x128xf32>
    %c0_6 = arith.constant 0 : index
    %c0_7 = arith.constant 0 : index
    %9 = vector.load %arg7[%c0_6, %c0_7] : memref<256x128xf32, #tpu.memory_space<vmem>>, vector<256x128xf32>
    tpu.vector_store %arg7[%c0_6, %c0_7], %8 {strides = array<i32>} : memref<256x128xf32, #tpu.memory_space<vmem>>, vector<256x128xf32>,
    %c0_8 = arith.constant 0 : index
    %c0_9 = arith.constant 0 : index
    %10 = vector.load %arg8[%c0_8, %c0_9] : memref<256x1xf32, #tpu.memory_space<vmem>>, vector<256x1xf32>
    %cst_10 = arith.constant dense<0.000000e+00> : vector<256xf32>
    %11 = vector.multi_reduction <add>, %4, %cst_10 [1] : vector<256x256xf32> to vector<256xf32>
    %12 = vector.shape_cast %11 : vector<256xf32> to vector<256x1xf32>
    %13 = arith.addf %10, %12 : vector<256x1xf32>
    %c0_11 = arith.constant 0 : index
    %c0_12 = arith.constant 0 : index
    %14 = vector.load %arg8[%c0_11, %c0_12] : memref<256x1xf32, #tpu.memory_space<vmem>>, vector<256x1xf32>
    tpu.vector_store %arg8[%c0_11, %c0_12], %13 {strides = array<i32>} : memref<256x1xf32, #tpu.memory_space<vmem>>, vector<256x1xf32>,
    %c1_i32 = arith.constant 1 : i32
    %15 = arith.cmpi eq, %arg1, %c1_i32 : i32
    %16 = arith.extui %15 : i1 to i32
    %c0_i32_13 = arith.constant 0 : i32
    %17 = arith.cmpi ne, %16, %c0_i32_13 : i32
    scf.if %17 {
      %c0_14 = arith.constant 0 : index
      %c0_15 = arith.constant 0 : index
      %18 = vector.load %arg8[%c0_14, %c0_15] : memref<256x1xf32, #tpu.memory_space<vmem>>, vector<256x1xf32>
      %cst_16 = arith.constant 1.000000e+00 : f32
      %19 = vector.broadcast %cst_16 : f32 to vector<256x1xf32>
      %20 = arith.addf %18, %19 : vector<256x1xf32>
      %21 = tpu.reciprocal %20 {approx = true} : vector<256x1xf32> -> vector<256x1xf32>
      %c0_17 = arith.constant 0 : index
      %c0_18 = arith.constant 0 : index
      %22 = vector.load %arg7[%c0_17, %c0_18] : memref<256x128xf32, #tpu.memory_space<vmem>>, vector<256x128xf32>
      %23 = vector.broadcast %21 : vector<256x1xf32> to vector<256x128xf32>
      %24 = arith.mulf %22, %23 : vector<256x128xf32>
      %c0_19 = arith.constant 0 : index
      %c0_20 = arith.constant 0 : index
      %25 = vector.load %arg2[%c0_19, %c0_20] : memref<256x32xf32, #tpu.memory_space<vmem>>, vector<256x32xf32>
      %c0_21 = arith.constant 0 : index
      %c0_22 = arith.constant 0 : index
      %26 = vector.load %arg5[%c0_21, %c0_22] : memref<32x128xf32, #tpu.memory_space<vmem>>, vector<32x128xf32>
      %cst_23 = arith.constant dense<0.000000e+00> : vector<256x128xf32>
      %27 = tpu.matmul %25, %26, %cst_23 {dimension_numbers = #tpu.dot_dimension_numbers<[1], [0], [0], [1], [0, 0, 1, 1], [], []>} : vector<256x32xf32>, vector<32x128xf32>, vector<256x128xf32> -> vector<256x128xf32>
      %28 = arith.addf %24, %27 : vector<256x128xf32>
      %c0_24 = arith.constant 0 : index
      %c0_25 = arith.constant 0 : index
      %29 = vector.load %arg6[%c0_24, %c0_25] : memref<256x128xf32, #tpu.memory_space<vmem>>, vector<256x128xf32>
      tpu.vector_store %arg6[%c0_24, %c0_25], %28 {strides = array<i32>} : memref<256x128xf32, #tpu.memory_space<vmem>>, vector<256x128xf32>,
    } else {
    }
    return
  }
  func.func @transform_0(%arg0: i32, %arg1: i32) -> (i32, i32) {
    %c0_i32 = arith.constant 0 : i32
    %c0_i32_0 = arith.constant 0 : i32
    return %arg0, %c0_i32 : i32, i32
  }
  func.func @transform_1(%arg0: i32, %arg1: i32) -> (i32, i32) {
    %c0_i32 = arith.constant 0 : i32
    return %arg0, %arg1 : i32, i32
  }
  func.func @transform_2(%arg0: i32, %arg1: i32) -> (i32, i32) {
    %c0_i32 = arith.constant 0 : i32
    %c0_i32_0 = arith.constant 0 : i32
    return %arg1, %c0_i32 : i32, i32
  }
  func.func @transform_3(%arg0: i32, %arg1: i32) -> (i32, i32) {
    %c0_i32 = arith.constant 0 : i32
    %c0_i32_0 = arith.constant 0 : i32
    %c0_i32_1 = arith.constant 0 : i32
    return %c0_i32, %c0_i32_0 : i32, i32
  }
  func.func @transform_4(%arg0: i32, %arg1: i32) -> (i32, i32) {
    %c0_i32 = arith.constant 0 : i32
    %c0_i32_0 = arith.constant 0 : i32
    return %arg0, %c0_i32 : i32, i32
  }
}

</mosaic_0001>

<bundles_post_ra>
// kernel: tpu_custom_call.1
= control target key start
LH: loop header
LB: loop body
LE: loop exit
PB: predicated region body
PF: predicated region fallthrough
CT: control target
= control target key end

     0   :  { %9 = vsyncpa [#allocation5], 0  ;;  %s3384_s0 = inlined_call_operand.vmem [shape: f32[512,32], index: 0, kind: input, shape index: {}]   ;;  %s3385_s1 = inlined_call_operand.hbm [shape: bf16[512,512], index: 1, kind: input, shape index: {}]   ;;  %s3386_s2 = inlined_call_operand.vmem [shape: f32[512,128], index: 2, kind: input, shape index: {}]   ;;  %s3387_s3 = inlined_call_operand.vmem [shape: f32[32,128], index: 3, kind: input, shape index: {}]   ;;  %s3388_s4 = inlined_call_operand.hbm [shape: f32[512,128], index: 4, kind: output, shape index: {}]  }
   0x1   :  { %11 = vsyncpa [#allocation5 + $0x1], 0 }
   0x2   :  { %12 = vsyncpa [#allocation6], 0 }
   0x3   :  { %14 = vsyncpa [#allocation6 + $0x1], 0  ;;  %s2468_s15 = smov 0   ;;  %s2470_s16 = smov 0  }
   0x4   :  { %s2472_s17 = smov 0   ;;  %s2474_s18 = smov 0  }
   0x5   :  { %s2476_s19 = smov 0   ;;  %s2478_s20 = smov 0  }
   0x6   :  { %s2480_s21 = smov 0   ;;  %s2482_s22 = smov 0  }
   0x7   :  { %s2484_s23 = smov 0   ;;  %s2486_s24 = smov 0  }
   0x8   :  { %s2488_s25 = smov 0  }
   0x9 LB: > { %3402 = sst [smem:[#allocation10_spill]] %s2411_s20  ;;  %s1862_s26 = sadd.s32 4294967295, %s2431_s25   ;;  %s2431_s25 = sphi %s2488_s25, %s20_s25   ;;  %s2427_s24 = sphi %s2486_s24, %s3435_s24   ;;  %s2423_s23 = sphi %s2484_s23, %s3434_s23   ;;  %s2419_s22 = sphi %s2482_s22, %s3433_s22   ;;  %s2415_s21 = sphi %s2480_s21, %s3432_s21   ;;  %s2411_s20 = sphi %s2478_s20, %s3424_s20   ;;  %s2407_s19 = sphi %s2476_s19, %s3431_s19   ;;  %s2403_s18 = sphi %s2474_s18, %s3430_s18   ;;  %s2399_s17 = sphi %s2472_s17, %s3429_s17   ;;  %s2395_s16 = sphi %s2470_s16, %s3428_s16   ;;  %s2391_s15 = sphi %s2468_s15, %s3427_s15  }
   0xa   : > { %s1863_s27 = sadd.s32 4294967294, %s2431_s25   ;;  %s29_s28 = sadd.s32 1, %s2423_s23 }
   0xb   : > { %s32_s29 = sadd.s32 1, %s2427_s24  ;;  %p30_p0 = scmp.ge.s32.totalorder %s29_s28, 2 }
   0xc   : > { %s67_s30 = sadd.s32 1, %s2411_s20  ;;  %p74_p1 = scmp.ne.s32.totalorder %s2411_s20, %s2407_s19 }
   0xd   : > { %p75_p2 = scmp.eq.s32.totalorder %s2431_s25, 0  ;;  %s3437_s28 = smov (%p30_p0, %s29_s28), 0 }
   0xe   : > { %3403 = sst [smem:[#allocation11_spill]] %s3437_s28  ;;  %s3439_s29 = smov (!%p30_p0, %s32_s29), %s2427_s24 }
   0xf   : > { %s63_s5 = ssub.s32 %s2423_s23, %s3437_s28  ;;  %p2534_p3 = por %p75_p2, %p74_p1 }
  0x10   : > { %p34_p4 = scmp.ge.s32.totalorder %s3439_s29, 2  ;;  %p80_p5 = scmp.ne.s32.totalorder %s2407_s19, %s2403_s18 }
  0x11   : > { %p81_p6 = scmp.eq.s32.totalorder %s1862_s26, 0  ;;  %s140_s7 = sadd.s32 1, %s2399_s17 }
  0x12   : > { %s3441_s29 = smov (%p34_p4, %s3439_s29), 0  ;;  %p150_p8 = scmp.ne.s32.totalorder %s2399_s17, %s2395_s16 }
  0x13   : > { %3405 = sst [smem:[#allocation12_spill]] %s3441_s29  ;;  %p2542_p7 = por %p81_p6, %p80_p5 }
  0x14   : > { %s62_s9 = ssub.s32 %s2427_s24, %s3441_s29  ;;  %p151_p9 = scmp.eq.s32.totalorder %s1862_s26, 3 }
  0x15   : > { %s64_s10 = sor.u32 %s63_s5, %s62_s9  ;;  %p138_p10 = scmp.eq.s32.totalorder %s62_s9, 0 }
  0x16   : > { %p65_p11 = scmp.eq.s32.totalorder %s64_s10, 0  ;;  %p2550_p12 = por %p151_p9, %p150_p8 }
  0x17   : > { %s2555_s12 = scalar_select %p138_p10, %s2399_s17, %s140_s7  }
  0x18   : > { %s3407_s11 = scalar_select %p2550_p12, 1, 0 }
  0x19   : > { %s2558_s13 = scalar_select %p65_p11, %s2411_s20, %s67_s30  }
  0x1a   : > { %p156_p13 = scmp.ne.s32.totalorder %s2395_s16, %s2391_s15  ;;  %p157_p0 = scmp.eq.s32.totalorder %s1863_s27, 3 }
  0x1b   : > { %3408 = sst [smem:[#allocation13_spill]] %s2558_s13  ;;  %p2115_p1 = scmp.lt.s32.totalorder %s2431_s25, 4 }
  0x1c   : > { %p2563_p2 = por %p157_p0, %p156_p13  ;;  %s189_s18 = sand.u32 1, %s2411_s20  }
  0x1d   : > { %s1866_s26 = sshll.u32 %s189_s18, 8  ;;  %s1868_s5 = sshll.u32 %s2423_s23, 1 }
  0x1e   : > { %s3409_s14 = scalar_select %p2563_p2, 1, 0 }
  0x1f   : > { %s1917_s9 = sshll.u32 %s2427_s24, 7  ;;  %s193_s10 = scalar_lea.vmem [#allocation4], %s1866_s26 }
  0x20   : > { %s203_s29 = sshll.u32 %s193_s10, 4  ;;  %s200_s28 = sadd.s32 %s1917_s9, %s1868_s5  ;;  %s2570_s29 = int_to_ptr.vmem [resolvable:$true] %s203_s29 }
  0x21   : > { %s1870_s7 = sshll.u32 %s200_s28, 6  ;;  %p2574_p4 = pnand %p2115_p1, %p2534_p3 }
  0x22   : > { %s2581_s20 = scalar_lea.hbm %s3385_s1, %s1870_s7  ;;  %s2584_s26 = scalar_lea.sflag [#allocation5], %s189_s18 }
  0x23   : > { %s2279_s28 = scalar_lea.hbm %s2581_s20, 4096  ;;  %p2281_p3 = pneg %p2574_p4 }
  0x24   : > { %p2280_p6 = scmp.ne.s32.totalorder %s2581_s20, %s2279_s28  ;;  %s2284_s5 = scalar_lea.hbm %s3385_s1, 16384 }
  0x25   : > { %p2285_p10 = scmp.lt.u32.totalorder %s2581_s20, %s3385_s1  ;;  %p2286_p11 = scmp.lt.u32.totalorder %s2284_s5, %s2279_s28 }
  0x26   : > { %p2282_p8 = pnand %p2281_p3, %p2280_p6  ;;  %p2288_p0 = scmp.lt.u32.totalorder %s2279_s28, %s2581_s20 }
  0x27   : > { %p2287_p13 = por %p2286_p11, %p2285_p10 }
  0x28   : > { %p2283_p9 = pneg %p2282_p8 }
  0x29   : > { %p2289_p1 = por %p2288_p0, %p2287_p13 }
  0x2b   : > { %p2290_p5 = pnand %p2289_p1, %p2283_p9 }
  0x2d   : > { %2293 = shalt.err (!%p2290_p5)
}
  0x2e   : > { %s2294_s18 = scalar_lea.vmem %s2570_s29, 4096  ;;  %s2433_s7 = smov [#allocation4]  }
  0x2f   : > { %p2295_p6 = scmp.ne.s32.totalorder %s2570_s29, %s2294_s18  ;;  %s2299_s27 = sshll.u32 %s2433_s7, 4  ;;  %s2300_s27 = int_to_ptr.vmem [resolvable:$false] %s2299_s27 }
  0x30   : > { %s2301_s6 = scalar_lea.vmem %s2300_s27, 8192  ;;  %p2302_p12 = scmp.lt.s32.totalorder %s2570_s29, %s2300_s27 }
  0x31   : > { %p2297_p8 = pnand %p2295_p6, %p2281_p3  ;;  %p2303_p10 = scmp.lt.s32.totalorder %s2301_s6, %s2294_s18 }
  0x33   : > { %p2298_p2 = pneg %p2297_p8  ;;  %p2304_p11 = por %p2303_p10, %p2302_p12 }
  0x35   : > { %p2305_p13 = pnand %p2304_p11, %p2298_p2 }
  0x37   : > { %2308 = shalt.err (!%p2305_p13)
}
  0x38   : > { %s2434_s28 = smov 256   ;;  %s2435_s13 = smov 128  }
  0x39   : > { %s2436_s5 = smov 8   ;;  %p220_p5 = scmp.lt.s32.totalorder %s2431_s25, 5 }
  0x3a   : > { %2110 = dma.hbm_to_vmem [thread:$0]  (!%p2574_p4), %s2581_s20, 4096, %s2570_s29, %s2584_s26, %s2434_s28, %s2435_s13, %s2436_s5  }
  0x3b   : > { %p3411_p3 = scmp.ge.s32.totalorder %s2431_s25, 1 }
  0x3d   : > { %p221_p9 = pnand %p3411_p3, %p220_p5 }
  0x3e   : > { %s226_s9 = sand.u32 (!%p221_p9), 1, %s2407_s19  }
  0x3f   : > { %224 = sbr.rel (%p221_p9) target bundleno = 703 (0x2bf), region = 36  ;;  %s1872_s10 = sshll.u32 (!%p221_p9), %s226_s9, 8 }
  0x40   : > { %s227_s18 = scalar_lea.sflag (!%p221_p9), [#allocation5], %s226_s9  ;;  %s2616_s7 = scalar_lea.vmem (!%p221_p9), [#allocation4], %s1872_s10 }
  0x46   : > { %2382 = dma.done.wait (%p2542_p7), %s227_s18, 4096  }
  0x47   : > { %2384 = vsyncadd (%p2542_p7), %s227_s18, 4294963200  ;;  %s262_s20 = sand.u32 1, %s2395_s16   ;;  %s1874_s29 = sshll.u32 %s2419_s22, 5 }
  0x48   : > { %s1873_s30 = sshll.u32 %s262_s20, 8  ;;  %p266_p12 = scmp.lt.s32.totalorder %s1874_s29, 63 }
  0x49   : > { %s1876_s26 = sshll.u32 %s2415_s21, 5  ;;  %s2637_s18 = scalar_lea.vmem [#allocation7], %s1873_s30 }
  0x4a   : > { %s3443_s29 = smov (!%p266_p12, %s1874_s29), 63  ;;  %p274_p2 = scmp.lt.s32.totalorder %s1876_s26, 63 }
  0x4b   : > { %s1875_s27 = sshll.u32 %s3443_s29, 3  ;;  %p1878_p7 = scmp.ne.s32.totalorder %s2415_s21, 0 }
  0x4c   : > { %s2630_s13 = scalar_lea.vmem %s3384_s0, %s1875_s27  ;;  %s3445_s26 = smov (!%p274_p2, %s1876_s26), 63  ;;  %vm316_vm0 = vcmask (!%p1878_p7), 7168   ;;  %v2437_v0 = vmov (!%p1878_p7), 0.0  }
  0x4d   : > { %s1877_s8 = sshll.u32 %s3445_s26, 3  ;;  %283 = sbr.rel (%p1878_p7) target bundleno = 109 (0x6d), region = 44  ;;  %284 = vst [vmem:[#allocation2] sm:$0xff] (!%p1878_p7), %v2437_v0  ;;  %285 = vst [vmem:[#allocation2 + $0x8] sm:$0xff] (!%p1878_p7), %v2437_v0 }
  0x4e   : > { %s2635_s10 = scalar_lea.vmem %s3386_s2, %s1877_s8  ;;  %286 = vst [vmem:[#allocation2 + $0x10] sm:$0xff] (!%p1878_p7), %v2437_v0  ;;  %287 = vst [vmem:[#allocation2 + $0x18] sm:$0xff] (!%p1878_p7), %v2437_v0 }
  0x4f   : > { %288 = vst [vmem:[#allocation2 + $0x20] sm:$0xff] (!%p1878_p7), %v2437_v0  ;;  %289 = vst [vmem:[#allocation2 + $0x28] sm:$0xff] (!%p1878_p7), %v2437_v0 }
  0x50   : > { %290 = vst [vmem:[#allocation2 + $0x30] sm:$0xff] (!%p1878_p7), %v2437_v0  ;;  %291 = vst [vmem:[#allocation2 + $0x38] sm:$0xff] (!%p1878_p7), %v2437_v0 }
  0x51   : > { %292 = vst [vmem:[#allocation2 + $0x40] sm:$0xff] (!%p1878_p7), %v2437_v0  ;;  %293 = vst [vmem:[#allocation2 + $0x48] sm:$0xff] (!%p1878_p7), %v2437_v0 }
  0x52   : > { %294 = vst [vmem:[#allocation2 + $0x50] sm:$0xff] (!%p1878_p7), %v2437_v0  ;;  %295 = vst [vmem:[#allocation2 + $0x58] sm:$0xff] (!%p1878_p7), %v2437_v0 }
  0x53   : > { %296 = vst [vmem:[#allocation2 + $0x60] sm:$0xff] (!%p1878_p7), %v2437_v0  ;;  %297 = vst [vmem:[#allocation2 + $0x68] sm:$0xff] (!%p1878_p7), %v2437_v0 }
  0x54   : > { %298 = vst [vmem:[#allocation2 + $0x70] sm:$0xff] %v2437_v0  ;;  %299 = vst [vmem:[#allocation2 + $0x78] sm:$0xff] %v2437_v0 }
  0x55   : > { %300 = vst [vmem:[#allocation2 + $0x80] sm:$0xff] %v2437_v0  ;;  %301 = vst [vmem:[#allocation2 + $0x88] sm:$0xff] %v2437_v0 }
  0x56   : > { %302 = vst [vmem:[#allocation2 + $0x90] sm:$0xff] %v2437_v0  ;;  %303 = vst [vmem:[#allocation2 + $0x98] sm:$0xff] %v2437_v0 }
  0x57   : > { %304 = vst [vmem:[#allocation2 + $0xa0] sm:$0xff] %v2437_v0  ;;  %305 = vst [vmem:[#allocation2 + $0xa8] sm:$0xff] %v2437_v0 }
  0x58   : > { %306 = vst [vmem:[#allocation2 + $0xb0] sm:$0xff] %v2437_v0  ;;  %307 = vst [vmem:[#allocation2 + $0xb8] sm:$0xff] %v2437_v0 }
  0x59   : > { %308 = vst [vmem:[#allocation2 + $0xc0] sm:$0xff] %v2437_v0  ;;  %309 = vst [vmem:[#allocation2 + $0xc8] sm:$0xff] %v2437_v0 }
  0x5a   : > { %310 = vst [vmem:[#allocation2 + $0xd0] sm:$0xff] %v2437_v0  ;;  %311 = vst [vmem:[#allocation2 + $0xd8] sm:$0xff] %v2437_v0 }
  0x5b   : > { %312 = vst [vmem:[#allocation2 + $0xe0] sm:$0xff] %v2437_v0  ;;  %313 = vst [vmem:[#allocation2 + $0xe8] sm:$0xff] %v2437_v0 }
  0x5c   : > { %314 = vst [vmem:[#allocation2 + $0xf0] sm:$0xff] %v2437_v0  ;;  %315 = vst [vmem:[#allocation2 + $0xf8] sm:$0xff] %v2437_v0 }
  0x5d   : > { %317 = vst.msk [vmem:[#allocation3] sm:$0xff] %vm316_vm0, %v2437_v0  ;;  %318 = vst.msk [vmem:[#allocation3 + $0x8] sm:$0xff] %vm316_vm0, %v2437_v0 }
  0x5e   : > { %319 = vst.msk [vmem:[#allocation3 + $0x10] sm:$0xff] %vm316_vm0, %v2437_v0  ;;  %320 = vst.msk [vmem:[#allocation3 + $0x18] sm:$0xff] %vm316_vm0, %v2437_v0 }
  0x5f   : > { %321 = vst.msk [vmem:[#allocation3 + $0x20] sm:$0xff] %vm316_vm0, %v2437_v0  ;;  %322 = vst.msk [vmem:[#allocation3 + $0x28] sm:$0xff] %vm316_vm0, %v2437_v0 }
  0x60   : > { %323 = vst.msk [vmem:[#allocation3 + $0x30] sm:$0xff] %vm316_vm0, %v2437_v0  ;;  %324 = vst.msk [vmem:[#allocation3 + $0x38] sm:$0xff] %vm316_vm0, %v2437_v0 }
  0x61   : > { %325 = vst.msk [vmem:[#allocation3 + $0x40] sm:$0xff] %vm316_vm0, %v2437_v0  ;;  %326 = vst.msk [vmem:[#allocation3 + $0x48] sm:$0xff] %vm316_vm0, %v2437_v0 }
  0x62   : > { %327 = vst.msk [vmem:[#allocation3 + $0x50] sm:$0xff] %vm316_vm0, %v2437_v0  ;;  %328 = vst.msk [vmem:[#allocation3 + $0x58] sm:$0xff] %vm316_vm0, %v2437_v0 }
  0x63   : > { %329 = vst.msk [vmem:[#allocation3 + $0x60] sm:$0xff] %vm316_vm0, %v2437_v0  ;;  %330 = vst.msk [vmem:[#allocation3 + $0x68] sm:$0xff] %vm316_vm0, %v2437_v0 }
  0x64   : > { %331 = vst.msk [vmem:[#allocation3 + $0x70] sm:$0xff] %vm316_vm0, %v2437_v0  ;;  %332 = vst.msk [vmem:[#allocation3 + $0x78] sm:$0xff] %vm316_vm0, %v2437_v0 }
  0x65   : > { %333 = vst.msk [vmem:[#allocation3 + $0x80] sm:$0xff] %vm316_vm0, %v2437_v0  ;;  %334 = vst.msk [vmem:[#allocation3 + $0x88] sm:$0xff] %vm316_vm0, %v2437_v0 }
  0x66   : > { %335 = vst.msk [vmem:[#allocation3 + $0x90] sm:$0xff] %vm316_vm0, %v2437_v0  ;;  %336 = vst.msk [vmem:[#allocation3 + $0x98] sm:$0xff] %vm316_vm0, %v2437_v0 }
  0x67   : > { %337 = vst.msk [vmem:[#allocation3 + $0xa0] sm:$0xff] %vm316_vm0, %v2437_v0  ;;  %338 = vst.msk [vmem:[#allocation3 + $0xa8] sm:$0xff] %vm316_vm0, %v2437_v0 }
  0x68   : > { %339 = vst.msk [vmem:[#allocation3 + $0xb0] sm:$0xff] %vm316_vm0, %v2437_v0  ;;  %340 = vst.msk [vmem:[#allocation3 + $0xb8] sm:$0xff] %vm316_vm0, %v2437_v0 }
  0x69   : > { %341 = vst.msk [vmem:[#allocation3 + $0xc0] sm:$0xff] %vm316_vm0, %v2437_v0  ;;  %342 = vst.msk [vmem:[#allocation3 + $0xc8] sm:$0xff] %vm316_vm0, %v2437_v0 }
  0x6a   : > { %343 = vst.msk [vmem:[#allocation3 + $0xd0] sm:$0xff] %vm316_vm0, %v2437_v0  ;;  %344 = vst.msk [vmem:[#allocation3 + $0xd8] sm:$0xff] %vm316_vm0, %v2437_v0 }
  0x6b   : > { %345 = vst.msk [vmem:[#allocation3 + $0xe0] sm:$0xff] %vm316_vm0, %v2437_v0  ;;  %346 = vst.msk [vmem:[#allocation3 + $0xe8] sm:$0xff] %vm316_vm0, %v2437_v0 }
  0x6c   : > { %347 = vst.msk [vmem:[#allocation3 + $0xf0] sm:$0xff] %vm316_vm0, %v2437_v0  ;;  %348 = vst.msk [vmem:[#allocation3 + $0xf8] sm:$0xff] %vm316_vm0, %v2437_v0 }
  0x6d PF: > { %v477_v1 = vld [vmem:[%s2635_s10] sm:$0xff]  ;;  %v478_v2 = vld [vmem:[%s2635_s10 + $0x8] sm:$0xff]  ;;  %v479_v3 = vld [vmem:[%s2635_s10 + $0x10] sm:$0xff]  ;;  %v2438_v4 = vmov 0.0|0.0   ;;  %vm958_vm1 = vcmask 7168   ;;  %p1879_p4 = scmp.ne.s32.totalorder %s2415_s21, 1 }
  0x6e   : > { %2011 = vmatprep.subr.bf16.mxu0 %v2438_v4  ;;  %2067 = vmatprep.subr.bf16.mxu1 %v2438_v4  ;;  %v2012_v5 = vpack.c.bf16 %v478_v2, %v477_v1  ;;  %v480_v6 = vld [vmem:[%s2635_s10 + $0x18] sm:$0xff]  ;;  %v481_v8 = vld [vmem:[%s2635_s10 + $0x20] sm:$0xff]  ;;  %v482_v9 = vld [vmem:[%s2635_s10 + $0x28] sm:$0xff]  ;;  %vm1351_vm2 = vcmask (!%p1879_p4), 261120  }
  0x6f   : > { %v2015_v7 = vpack.c.bf16 %v480_v6, %v479_v3  ;;  %v2018_v10 = vpack.c.bf16 %v482_v9, %v481_v8  ;;  %v483_v11 = vld [vmem:[%s2635_s10 + $0x30] sm:$0xff]  ;;  %v484_v12 = vld [vmem:[%s2635_s10 + $0x38] sm:$0xff]  ;;  %v2751_v13 = vld [vmem:[%s2616_s7] sm:$0xff] }
  0x70   : > { %2013 = vmatpush1.bf16.msra.mxu0 %v2012_v5  ;;  %2083 = vmatpush1.bf16.msra.mxu1 %v2012_v5  ;;  %v2021_v14 = vpack.c.bf16 %v484_v12, %v483_v11  ;;  %v382_v15 = vunpack.c.h.bf16 %v2751_v13  ;;  %v2755_v16 = vld [vmem:[%s2616_s7 + $0x80] sm:$0xff]  ;;  %v486_v18 = vld [vmem:[%s2635_s10 + $0x48] sm:$0xff]  ;;  %v487_v21 = vld [vmem:[%s2635_s10 + $0x50] sm:$0xff]  ;;  %v381_v32 = vunpack.c.l.bf16 %v2751_v13 }
  0x71   : > { %2014 = vmatprep.subr.bf16.mxu0 %v2438_v4  ;;  %2068 = vmatprep.subr.bf16.mxu1 %v2438_v4  ;;  %v485_v17 = vld [vmem:[%s2635_s10 + $0x40] sm:$0xff]  ;;  %v414_v19 = vunpack.c.h.bf16 %v2755_v16  ;;  %v488_v22 = vld [vmem:[%s2635_s10 + $0x58] sm:$0xff]  ;;  %v490_v25 = vld [vmem:[%s2635_s10 + $0x68] sm:$0xff] }
  0x72   : > { %573 = vmatprep.mubr.f32.mxu0 %v382_v15  ;;  %v2024_v20 = vpack.c.bf16 %v486_v18, %v485_v17  ;;  %v2027_v23 = vpack.c.bf16 %v488_v22, %v487_v21  ;;  %v489_v24 = vld [vmem:[%s2635_s10 + $0x60] sm:$0xff]  ;;  %v2773_v26 = vld [vmem:[%s2616_s7 + $0x10] sm:$0xff]  ;;  %v492_v29 = vld [vmem:[%s2635_s10 + $0x78] sm:$0xff]  ;;  %v830_v43 = vadd.f32 %v382_v15, %v381_v32 }
  0x73   : > { %653 = vmatprep.mubr.f32.mxu1 %v414_v19  ;;  %v2030_v27 = vpack.c.bf16 %v490_v25, %v489_v24  ;;  %v491_v28 = vld [vmem:[%s2635_s10 + $0x70] sm:$0xff]  ;;  %v2778_v30 = vld [vmem:[%s2616_s7 + $0x8] sm:$0xff]  ;;  %v2783_v31 = vld [vmem:[%s2616_s7 + $0x18] sm:$0xff]  ;;  %v386_v33 = vunpack.c.h.bf16 %v2773_v26  ;;  %v385_v34 = vunpack.c.l.bf16 %v2773_v26 }
  0x74   : > { %2016 = vmatpush1.bf16.msra.mxu0 %v2015_v7  ;;  %2084 = vmatpush1.bf16.msra.mxu1 %v2015_v7  ;;  %v2033_v35 = vpack.c.bf16 %v492_v29, %v491_v28  ;;  %v384_v36 = vunpack.c.h.bf16 %v2778_v30  ;;  %v383_v37 = vunpack.c.l.bf16 %v2778_v30  ;;  %v493_v38 = vld [vmem:[%s2635_s10 + $0x80] sm:$0xff]  ;;  %v494_v39 = vld [vmem:[%s2635_s10 + $0x88] sm:$0xff]  ;;  %v388_v40 = vunpack.c.h.bf16 %v2783_v31  ;;  %v495_v49 = vld [vmem:[%s2635_s10 + $0x90] sm:$0xff] }
  0x75   : > { %2017 = vmatprep.subr.bf16.mxu0 %v2438_v4  ;;  %2069 = vmatprep.subr.bf16.mxu1 %v2438_v4  ;;  %v387_v41 = vunpack.c.l.bf16 %v2783_v31  ;;  %v836_v42 = vadd.f32 %v386_v33, %v385_v34  ;;  %v2803_v44 = vld [vmem:[%s2616_s7 + $0x20] sm:$0xff]  ;;  %v2806_v45 = vld [vmem:[%s2616_s7 + $0x28] sm:$0xff]  ;;  %v2036_v48 = vpack.c.bf16 %v494_v39, %v493_v38  ;;  %v496_v50 = vld [vmem:[%s2635_s10 + $0x98] sm:$0xff] }
  0x76   : > { %831 = vadd.xlane.f32.xlu0 %v830_v43  ;;  %v833_v47 = vadd.f32 %v384_v36, %v383_v37  ;;  %v390_v51 = vunpack.c.h.bf16 %v2803_v44  ;;  %v389_v52 = vunpack.c.l.bf16 %v2803_v44  ;;  %v392_v53 = vunpack.c.h.bf16 %v2806_v45  ;;  %v2825_v55 = vld [vmem:[%s2616_s7 + $0x30] sm:$0xff]  ;;  %v2828_v56 = vld [vmem:[%s2616_s7 + $0x38] sm:$0xff]  ;;  %v497_v60 = vld [vmem:[%s2635_s10 + $0xa0] sm:$0xff] }
  0x77   : > { %837 = vadd.xlane.f32.xlu1 %v836_v42  ;;  %v839_v46 = vadd.f32 %v388_v40, %v387_v41  ;;  %v391_v54 = vunpack.c.l.bf16 %v2806_v45  ;;  %v2039_v59 = vpack.c.bf16 %v496_v50, %v495_v49  ;;  %v498_v61 = vld [vmem:[%s2635_s10 + $0xa8] sm:$0xff]  ;;  %v394_v62 = vunpack.c.h.bf16 %v2825_v55  ;;  %v2847_v2 = vld [vmem:[%s2616_s7 + $0x40] sm:$0xff]  ;;  %v499_v8 = vld [vmem:[%s2635_s10 + $0xb0] sm:$0xff] }
  0x78   : > { %2019 = vmatpush1.bf16.msra.mxu0 %v2018_v10  ;;  %2085 = vmatpush1.bf16.msra.mxu1 %v2018_v10  ;;  %v842_v58 = vadd.f32 %v390_v51, %v389_v52  ;;  %v393_v63 = vunpack.c.l.bf16 %v2825_v55  ;;  %v396_v0 = vunpack.c.h.bf16 %v2828_v56  ;;  %v395_v1 = vunpack.c.l.bf16 %v2828_v56  ;;  %v2850_v3 = vld [vmem:[%s2616_s7 + $0x48] sm:$0xff]  ;;  %v500_v9 = vld [vmem:[%s2635_s10 + $0xb8] sm:$0xff]  ;;  %v2869_v15 = vld [vmem:[%s2616_s7 + $0x50] sm:$0xff] }
  0x79   : > { %2020 = vmatprep.subr.bf16.mxu0 %v2438_v4  ;;  %2070 = vmatprep.subr.bf16.mxu1 %v2438_v4  ;;  %v845_v57 = vadd.f32 %v392_v53, %v391_v54  ;;  %v2042_v7 = vpack.c.bf16 %v498_v61, %v497_v60  ;;  %v398_v10 = vunpack.c.h.bf16 %v2847_v2  ;;  %v397_v11 = vunpack.c.l.bf16 %v2847_v2  ;;  %v2872_v17 = vld [vmem:[%s2616_s7 + $0x58] sm:$0xff]  ;;  %v501_v22 = vld [vmem:[%s2635_s10 + $0xc0] sm:$0xff]  ;;  %v503_v43 = vld [vmem:[%s2635_s10 + $0xd0] sm:$0xff] }
  0x7a   : > { %834 = vadd.xlane.f32.xlu0 %v833_v47  ;;  %v851_v5 = vadd.f32 %v396_v0, %v395_v1  ;;  %v848_v6 = vadd.f32 %v394_v62, %v393_v63  ;;  %v400_v12 = vunpack.c.h.bf16 %v2850_v3  ;;  %v2045_v21 = vpack.c.bf16 %v500_v9, %v499_v8  ;;  %v2891_v29 = vld [vmem:[%s2616_s7 + $0x60] sm:$0xff] }
  0x7b   : > { %840 = vadd.xlane.f32.xlu1 %v839_v46  ;;  %v402_v24 = vunpack.c.h.bf16 %v2869_v15  ;;  %v401_v25 = vunpack.c.l.bf16 %v2869_v15  ;;  %v3401_v28 = vunpack.c.l.bf16 %v2872_v17  ;;  %v504_v46 = vld [vmem:[%s2635_s10 + $0xd8] sm:$0xff]  ;;  %v3400_v47 = vunpack.c.h.bf16 %v2891_v29  ;;  %v505_v9 = vld [vmem:[%s2635_s10 + $0xe0] sm:$0xff] }
  0x7c   : > { %2022 = vmatpush1.bf16.msra.mxu0 %v2021_v14  ;;  %2086 = vmatpush1.bf16.msra.mxu1 %v2021_v14  ;;  %v399_v14 = vunpack.c.l.bf16 %v2850_v3  ;;  %v2051_v61 = vpack.c.bf16 %v504_v46, %v503_v43  ;;  %v3412_v44 = vunpack.c.l.bf16 %v2872_v17  ;;  %v3413_v45 = vunpack.c.h.bf16 %v2891_v29 }
  0x7d   : > { %2023 = vmatprep.subr.bf16.mxu0 %v2438_v4  ;;  %2071 = vmatprep.subr.bf16.mxu1 %v2438_v4  ;;  %v860_v39 = vadd.f32 %v402_v24, %v401_v25 }
  0x7e   : > { %843 = vadd.xlane.f32.xlu0 %v842_v58  ;;  %v857_v18 = vadd.f32 %v400_v12, %v399_v14  ;;  %v2916_v58 = vld [vmem:[%s2616_s7 + $0x78] sm:$0xff] }
  0x7f   : > { %846 = vadd.xlane.f32.xlu1 %v845_v57  ;;  %v2913_v57 = vld [vmem:[%s2616_s7 + $0x70] sm:$0xff]  ;;  %v3393_v8 = vunpack.c.l.bf16 %v2916_v58 }
  0x80   : > { %2025 = vmatpush1.bf16.msra.mxu0 %v2024_v20  ;;  %2087 = vmatpush1.bf16.msra.mxu1 %v2024_v20  ;;  %v854_v20 = vadd.f32 %v398_v10, %v397_v11  ;;  %v3417_v55 = vunpack.c.h.bf16 %v2913_v57  ;;  %v3418_v56 = vunpack.c.l.bf16 %v2913_v57 }
  0x81   : > { %2026 = vmatprep.subr.bf16.mxu0 %v2438_v4  ;;  %2072 = vmatprep.subr.bf16.mxu1 %v2438_v4 }
  0x82   : > { %849 = vadd.xlane.f32.xlu0 %v848_v6  ;;  %v3395_v6 = vunpack.c.l.bf16 %v2913_v57 }
  0x83   : > { %852 = vadd.xlane.f32.xlu1 %v851_v5  ;;  %v3396_v5 = vunpack.c.h.bf16 %v2913_v57  ;;  %v805_v57 = vld [vmem:[#allocation3 + $0x38] sm:$0xff] }
  0x84   : > { %2028 = vmatpush1.bf16.msra.mxu0 %v2027_v23  ;;  %2088 = vmatpush1.bf16.msra.mxu1 %v2027_v23  ;;  %v502_v23 = vld [vmem:[%s2635_s10 + $0xc8] sm:$0xff] }
  0x85   : > { %2029 = vmatprep.subr.bf16.mxu0 %v2438_v4  ;;  %2073 = vmatprep.subr.bf16.mxu1 %v2438_v4  ;;  %v2048_v42 = vpack.c.bf16 %v502_v23, %v501_v22  ;;  %v872_v22 = vadd.f32 %v3396_v5, %v3395_v6 }
  0x86   : > { %855 = vadd.xlane.f32.xlu0 %v854_v20  ;;  %v2935_v20 = vld [vmem:[%s2616_s7 + $0x88] sm:$0xff] }
  0x87   : > { %858 = vadd.xlane.f32.xlu1 %v857_v18  ;;  %v506_v18 = vld [vmem:[%s2635_s10 + $0xe8] sm:$0xff]  ;;  %v416_v43 = vunpack.c.h.bf16 %v2935_v20  ;;  %v415_v46 = vunpack.c.l.bf16 %v2935_v20 }
  0x88   : > { %2031 = vmatpush1.bf16.msra.mxu0 %v2030_v27  ;;  %2089 = vmatpush1.bf16.msra.mxu1 %v2030_v27  ;;  %v404_v27 = vunpack.c.h.bf16 %v2872_v17  ;;  %v2054_v23 = vpack.c.bf16 %v506_v18, %v505_v9 }
  0x89   : > { %2032 = vmatprep.subr.bf16.mxu0 %v2438_v4  ;;  %2074 = vmatprep.subr.bf16.mxu1 %v2438_v4 }
  0x8a   : > { %v863_v38 = vadd.f32 %v404_v27, %v3401_v28  ;;  %861 = vadd.xlane.f32.xlu0 %v860_v39  ;;  %v508_v39 = vld [vmem:[%s2635_s10 + $0xf8] sm:$0xff]  ;;  %v3040_v28 = vld [vmem:[%s2616_s7 + $0xe8] sm:$0xff] }
  0x8c   : > { %2034 = vmatpush1.bf16.msra.mxu0 %v2033_v35  ;;  %2090 = vmatpush1.bf16.msra.mxu1 %v2033_v35  ;;  %v2894_v35 = vld [vmem:[%s2616_s7 + $0x68] sm:$0xff] }
  0x8d   : > { %2035 = vmatprep.subr.bf16.mxu0 %v2438_v4  ;;  %2075 = vmatprep.subr.bf16.mxu1 %v2438_v4  ;;  %v3398_v49 = vunpack.c.h.bf16 %v2894_v35  ;;  %v3397_v50 = vunpack.c.l.bf16 %v2894_v35 }
  0x8e   : > { %864 = vadd.xlane.f32.xlu1 %v863_v38  ;;  %v507_v38 = vld [vmem:[%s2635_s10 + $0xf0] sm:$0xff] }
  0x8f   : > { %v2057_v18 = vpack.c.bf16 %v508_v39, %v507_v38 }
  0x90   : > { %2037 = vmatpush1.bf16.msra.mxu0 %v2036_v48  ;;  %2091 = vmatpush1.bf16.msra.mxu1 %v2036_v48  ;;  %v3399_v48 = vunpack.c.l.bf16 %v2891_v29 }
  0x91   : > { %2038 = vmatprep.subr.bf16.mxu0 %v2438_v4  ;;  %2076 = vmatprep.subr.bf16.mxu1 %v2438_v4 }
  0x92   : > { %v866_v60 = vadd.f32 %v3400_v47, %v3399_v48  ;;  %v2998_v48 = vld [vmem:[%s2616_s7 + $0xc8] sm:$0xff]  ;;  %v3020_v47 = vld [vmem:[%s2616_s7 + $0xd8] sm:$0xff] }
  0x94   : > { %2040 = vmatpush1.bf16.msra.mxu0 %v2039_v59  ;;  %2092 = vmatpush1.bf16.msra.mxu1 %v2039_v59  ;;  %v869_v59 = vadd.f32 %v3398_v49, %v3397_v50  ;;  %v2995_v49 = vld [vmem:[%s2616_s7 + $0xc0] sm:$0xff] }
  0x95   : > { %2041 = vmatprep.subr.bf16.mxu0 %v2438_v4  ;;  %2077 = vmatprep.subr.bf16.mxu1 %v2438_v4 }
  0x96   : > { %870 = vadd.xlane.f32.xlu1 %v869_v59  ;;  %867 = vadd.xlane.f32.xlu0 %v866_v60  ;;  %v367_v59 = vld [vmem:[%s2616_s7 + $0x90] sm:$0xff]  ;;  %v2954_v60 = vld [vmem:[%s2616_s7 + $0x98] sm:$0xff] }
  0x97   : > { %v417_v20 = vunpack.c.l.bf16 %v367_v59  ;;  %v419_v6 = vunpack.c.l.bf16 %v2954_v60 }
  0x98   : > { %2043 = vmatpush1.bf16.msra.mxu0 %v2042_v7  ;;  %2093 = vmatpush1.bf16.msra.mxu1 %v2042_v7  ;;  %v3394_v7 = vunpack.c.h.bf16 %v2916_v58 }
  0x99   : > { %2044 = vmatprep.subr.bf16.mxu0 %v2438_v4  ;;  %2078 = vmatprep.subr.bf16.mxu1 %v2438_v4 }
  0x9a   : > { %873 = vadd.xlane.f32.xlu0 %v872_v22  ;;  %v2966_v22 = vld [vmem:[%s2616_s7 + $0xa8] sm:$0xff] }
  0x9b   : > { %v424_v39 = vunpack.c.h.bf16 %v2966_v22 }
  0x9c   : > { %2046 = vmatpush1.bf16.msra.mxu0 %v2045_v21  ;;  %2094 = vmatpush1.bf16.msra.mxu1 %v2045_v21  ;;  %v875_v21 = vadd.f32 %v3394_v7, %v3393_v8  ;;  %v418_v8 = vunpack.c.h.bf16 %v367_v59  ;;  %v420_v7 = vunpack.c.h.bf16 %v2954_v60  ;;  %v2975_v59 = vld [vmem:[%s2616_s7 + $0xb0] sm:$0xff] }
  0x9d   : > { %2047 = vmatprep.subr.bf16.mxu0 %v2438_v4  ;;  %2079 = vmatprep.subr.bf16.mxu1 %v2438_v4  ;;  %v426_v5 = vunpack.c.h.bf16 %v2975_v59 }
  0x9e   : > { %876 = vadd.xlane.f32.xlu1 %v875_v21  ;;  %v2963_v21 = vld [vmem:[%s2616_s7 + $0xa0] sm:$0xff] }
  0x9f   : > { %v421_v38 = vunpack.c.l.bf16 %v2963_v21 }
  0xa0   : > { %2049 = vmatpush1.bf16.msra.mxu0 %v2048_v42  ;;  %2095 = vmatpush1.bf16.msra.mxu1 %v2048_v42  ;;  %v413_v42 = vunpack.c.l.bf16 %v2755_v16  ;;  %v887_v16 = vadd.f32 %v420_v7, %v419_v6 }
  0xa1   : > { %2050 = vmatprep.subr.bf16.mxu0 %v2438_v4  ;;  %2080 = vmatprep.subr.bf16.mxu1 %v2438_v4 }
  0xa2   : > { %v878_v9 = vadd.f32 %v414_v19, %v413_v42  ;;  %v884_v19 = vadd.f32 %v418_v8, %v417_v20 }
  0xa4   : > { %2052 = vmatpush1.bf16.msra.mxu0 %v2051_v61  ;;  %2096 = vmatpush1.bf16.msra.mxu1 %v2051_v61  ;;  %v881_v61 = vadd.f32 %v416_v43, %v415_v46 }
  0xa5   : > { %2053 = vmatprep.subr.bf16.mxu0 %v2438_v4  ;;  %2081 = vmatprep.subr.bf16.mxu1 %v2438_v4 }
  0xa6   : > { %882 = vadd.xlane.f32.xlu1 %v881_v61  ;;  %879 = vadd.xlane.f32.xlu0 %v878_v9  ;;  %v2978_v61 = vld [vmem:[%s2616_s7 + $0xb8] sm:$0xff] }
  0xa7   : > { %v427_v50 = vunpack.c.l.bf16 %v2978_v61 }
  0xa8   : > { %2055 = vmatpush1.bf16.msra.mxu0 %v2054_v23  ;;  %2097 = vmatpush1.bf16.msra.mxu1 %v2054_v23  ;;  %v422_v23 = vunpack.c.h.bf16 %v2963_v21 }
  0xa9   : > { %2056 = vmatprep.subr.bf16.mxu0 %v2438_v4  ;;  %2082 = vmatprep.subr.bf16.mxu1 %v2438_v4  ;;  %v423_v4 = vunpack.c.l.bf16 %v2966_v22 }
  0xaa   : > { %888 = vadd.xlane.f32.xlu1 %v887_v16  ;;  %885 = vadd.xlane.f32.xlu0 %v884_v19  ;;  %v425_v16 = vunpack.c.l.bf16 %v2975_v59  ;;  %v428_v19 = vunpack.c.h.bf16 %v2978_v61 }
  0xab   : > { %v893_v9 = vadd.f32 %v424_v39, %v423_v4 }
  0xac   : > { %2058 = vmatpush1.bf16.msra.mxu0 %v2057_v18  ;;  %2098 = vmatpush1.bf16.msra.mxu1 %v2057_v18  ;;  %v890_v18 = vadd.f32 %v422_v23, %v421_v38  ;;  %v899_v13 = vadd.f32 %v428_v19, %v427_v50 }
  0xae   : > { %894 = vadd.xlane.f32.xlu1 %v893_v9  ;;  %891 = vadd.xlane.f32.xlu0 %v890_v18  ;;  %v431_v9 = vunpack.c.l.bf16 %v2998_v48  ;;  %v3017_v18 = vld [vmem:[%s2616_s7 + $0xd0] sm:$0xff] }
  0xaf   : > { %574 = vmatmul.mubr.f32.vlgmr.msra.gmra.mrb[0].mxu0 %v381_v32  ;;  %654 = vmatmul.mubr.f32.vlgmr.msra.gmra.mrb[0].mxu1 %v413_v42  ;;  %v896_v32 = vadd.f32 %v426_v5, %v425_v16  ;;  %v429_v42 = vunpack.c.l.bf16 %v2995_v49 }
  0xb0   : > { %578 = vmatprep.mubr.f32.mxu0 %v384_v36  ;;  %658 = vmatprep.mubr.f32.mxu1 %v416_v43  ;;  %v430_v36 = vunpack.c.h.bf16 %v2995_v49  ;;  %v432_v43 = vunpack.c.h.bf16 %v2998_v48 }
  0xb2   : > { %900 = vadd.xlane.f32.xlu1 %v899_v13  ;;  %897 = vadd.xlane.f32.xlu0 %v896_v32  ;;  %v905_v30 = vadd.f32 %v432_v43, %v431_v9  ;;  %v435_v13 = vunpack.c.l.bf16 %v3020_v47  ;;  %v3037_v32 = vld [vmem:[%s2616_s7 + $0xe0] sm:$0xff] }
  0xb3   : > { %579 = vmatmul.mubr.f32.gmra.mrb[2].mxu0 %v383_v37  ;;  %659 = vmatmul.mubr.f32.gmra.mrb[2].mxu1 %v415_v46  ;;  %v434_v37 = vunpack.c.h.bf16 %v3017_v18  ;;  %v436_v46 = vunpack.c.h.bf16 %v3020_v47  ;;  %v437_v47 = vunpack.c.l.bf16 %v3037_v32 }
  0xb4   : > { %583 = vmatprep.mubr.f32.mxu0 %v386_v33  ;;  %663 = vmatprep.mubr.f32.mxu1 %v418_v8  ;;  %v902_v33 = vadd.f32 %v430_v36, %v429_v42  ;;  %v433_v8 = vunpack.c.l.bf16 %v3017_v18  ;;  %v379_v18 = vld [vmem:[%s2616_s7 + $0xf0] sm:$0xff] }
  0xb5   : > { %v911_v26 = vadd.f32 %v436_v46, %v435_v13 }
  0xb6   : > { %906 = vadd.xlane.f32.xlu1 %v905_v30  ;;  %903 = vadd.xlane.f32.xlu0 %v902_v33  ;;  %v380_v30 = vld [vmem:[%s2616_s7 + $0xf8] sm:$0xff] }
  0xb7   : > { %584 = vmatmul.mubr.f32.gmra.mrb[4].mxu0 %v385_v34  ;;  %664 = vmatmul.mubr.f32.gmra.mrb[4].mxu1 %v417_v20  ;;  %v908_v34 = vadd.f32 %v434_v37, %v433_v8  ;;  %v439_v20 = vunpack.c.l.bf16 %v3040_v28  ;;  %v443_v60 = vunpack.c.l.bf16 %v380_v30 }
  0xb8   : > { %588 = vmatprep.mubr.f32.mxu0 %v388_v40  ;;  %668 = vmatprep.mubr.f32.mxu1 %v420_v7  ;;  %v438_v40 = vunpack.c.h.bf16 %v3037_v32  ;;  %v440_v7 = vunpack.c.h.bf16 %v3040_v28  ;;  %v441_v28 = vunpack.c.l.bf16 %v379_v18 }
  0xba   : > { %912 = vadd.xlane.f32.xlu1 %v911_v26  ;;  %909 = vadd.xlane.f32.xlu0 %v908_v34  ;;  %v917_v31 = vadd.f32 %v440_v7, %v439_v20 }
  0xbb   : > { %589 = vmatmul.mubr.f32.gmra.mrb[6].mxu0 %v387_v41  ;;  %669 = vmatmul.mubr.f32.gmra.mrb[6].mxu1 %v419_v6  ;;  %v914_v41 = vadd.f32 %v438_v40, %v437_v47  ;;  %v444_v6 = vunpack.c.h.bf16 %v380_v30 }
  0xbc   : > { %593 = vmatprep.mubr.f32.mxu0 %v390_v51  ;;  %673 = vmatprep.mubr.f32.mxu1 %v422_v23  ;;  %v442_v51 = vunpack.c.h.bf16 %v379_v18 }
  0xbd   : > { %v923_v23 = vadd.f32 %v444_v6, %v443_v60 }
  0xbe   : > { %918 = vadd.xlane.f32.xlu1 %v917_v31  ;;  %915 = vadd.xlane.f32.xlu0 %v914_v41  ;;  %v920_v33 = vadd.f32 %v442_v51, %v441_v28  ;;  %v815_v41 = vld [vmem:[#allocation3 + $0x88] sm:$0xff] }
  0xbf   : > { %594 = vmatmul.mubr.f32.gmra.mrb[8].mxu0 %v389_v52  ;;  %674 = vmatmul.mubr.f32.gmra.mrb[8].mxu1 %v421_v38  ;;  %v3414_v52 = vunpack.c.l.bf16 %v2891_v29  ;;  %v802_v29 = vld [vmem:[#allocation3 + $0x20] sm:$0xff] }
  0xc0   : > { %598 = vmatprep.mubr.f32.mxu0 %v392_v53  ;;  %678 = vmatprep.mubr.f32.mxu1 %v424_v39  ;;  %v3415_v53 = vunpack.c.h.bf16 %v2894_v35  ;;  %v807_v39 = vld [vmem:[#allocation3 + $0x48] sm:$0xff] }
  0xc2   : > { %924 = vadd.xlane.f32.xlu1 %v923_v23  ;;  %921 = vadd.xlane.f32.xlu0 %v920_v33  ;;  %v817_v33 = vld [vmem:[#allocation3 + $0x98] sm:$0xff] }
  0xc3   : > { %599 = vmatmul.mubr.f32.gmra.mrb[10].mxu0 %v391_v54  ;;  %679 = vmatmul.mubr.f32.gmra.mrb[10].mxu1 %v423_v4  ;;  %v3416_v54 = vunpack.c.l.bf16 %v2894_v35  ;;  %v806_v4 = vld [vmem:[#allocation3 + $0x40] sm:$0xff] }
  0xc4   : > { %603 = vmatprep.mubr.f32.mxu0 %v394_v62  ;;  %683 = vmatprep.mubr.f32.mxu1 %v426_v5  ;;  %v3419_v62 = vunpack.c.h.bf16 %v2916_v58 }
  0xc7   : > { %604 = vmatmul.mubr.f32.gmra.mrb[12].mxu0 %v393_v63  ;;  %684 = vmatmul.mubr.f32.gmra.mrb[12].mxu1 %v425_v16  ;;  %v3420_v63 = vunpack.c.l.bf16 %v2916_v58  ;;  %v804_v58 = vld [vmem:[#allocation3 + $0x30] sm:$0xff] }
  0xc8   : > { %608 = vmatprep.mubr.f32.mxu0 %v396_v0  ;;  %688 = vmatprep.mubr.f32.mxu1 %v428_v19  ;;  %v800_v0 = vld [vmem:[#allocation3 + $0x10] sm:$0xff] }
  0xcb   : > { %609 = vmatmul.mubr.f32.gmra.mrb[14].mxu0 %v395_v1  ;;  %689 = vmatmul.mubr.f32.gmra.mrb[14].mxu1 %v427_v50  ;;  %v798_v1 = vld [vmem:[#allocation3] sm:$0xff] }
  0xcc   : > { %613 = vmatprep.mubr.f32.mxu0 %v398_v10  ;;  %693 = vmatprep.mubr.f32.mxu1 %v430_v36  ;;  %v809_v36 = vld [vmem:[#allocation3 + $0x58] sm:$0xff] }
  0xcf   : > { %614 = vmatmul.mubr.f32.gmra.mrb[16].mxu0 %v397_v11  ;;  %694 = vmatmul.mubr.f32.gmra.mrb[16].mxu1 %v429_v42  ;;  %v808_v42 = vld [vmem:[#allocation3 + $0x50] sm:$0xff] }
  0xd0   : > { %618 = vmatprep.mubr.f32.mxu0 %v400_v12  ;;  %698 = vmatprep.mubr.f32.mxu1 %v432_v43  ;;  %v801_v12 = vld [vmem:[#allocation3 + $0x18] sm:$0xff] }
  0xd3   : > { %619 = vmatmul.mubr.f32.gmra.mrb[18].mxu0 %v399_v14  ;;  %699 = vmatmul.mubr.f32.gmra.mrb[18].mxu1 %v431_v9  ;;  %v799_v14 = vld [vmem:[#allocation3 + $0x8] sm:$0xff] }
  0xd4   : > { %623 = vmatprep.mubr.f32.mxu0 %v402_v24  ;;  %703 = vmatprep.mubr.f32.mxu1 %v434_v37 }
  0xd7   : > { %624 = vmatmul.mubr.f32.gmra.mrb[20].mxu0 %v401_v25  ;;  %704 = vmatmul.mubr.f32.gmra.mrb[20].mxu1 %v433_v8 }
  0xd8   : > { %628 = vmatprep.mubr.f32.mxu0 %v404_v27  ;;  %708 = vmatprep.mubr.f32.mxu1 %v436_v46  ;;  %v803_v27 = vld [vmem:[#allocation3 + $0x28] sm:$0xff] }
  0xd9   : > { %v811_v46 = vld [vmem:[#allocation3 + $0x68] sm:$0xff] }
  0xdb   : > { %629 = vmatmul.mubr.f32.gmra.mrb[22].mxu0 %v3412_v44  ;;  %709 = vmatmul.mubr.f32.gmra.mrb[22].mxu1 %v435_v13  ;;  %v810_v13 = vld [vmem:[#allocation3 + $0x60] sm:$0xff]  ;;  %v816_v44 = vld [vmem:[#allocation3 + $0x90] sm:$0xff] }
  0xdc   : > { %633 = vmatprep.mubr.f32.mxu0 %v3413_v45  ;;  %713 = vmatprep.mubr.f32.mxu1 %v438_v40 }
  0xdf   : > { %634 = vmatmul.mubr.f32.gmra.mrb[24].mxu0 %v3414_v52  ;;  %714 = vmatmul.mubr.f32.gmra.mrb[24].mxu1 %v437_v47  ;;  %v813_v47 = vld [vmem:[#allocation3 + $0x78] sm:$0xff] }
  0xe0   : > { %638 = vmatprep.mubr.f32.mxu0 %v3415_v53  ;;  %718 = vmatprep.mubr.f32.mxu1 %v440_v7  ;;  %v812_v7 = vld [vmem:[#allocation3 + $0x70] sm:$0xff] }
  0xe3   : > { %639 = vmatmul.mubr.f32.gmra.mrb[26].mxu0 %v3416_v54  ;;  %719 = vmatmul.mubr.f32.gmra.mrb[26].mxu1 %v439_v20 }
  0xe4   : > { %643 = vmatprep.mubr.f32.mxu0 %v3417_v55  ;;  %723 = vmatprep.mubr.f32.mxu1 %v442_v51  ;;  %v814_v51 = vld [vmem:[#allocation3 + $0x80] sm:$0xff]  ;;  %v819_v55 = vld [vmem:[#allocation3 + $0xa8] sm:$0xff] }
  0xe7   : > { %644 = vmatmul.mubr.f32.gmra.mrb[28].mxu0 %v3418_v56  ;;  %724 = vmatmul.mubr.f32.gmra.mrb[28].mxu1 %v441_v28  ;;  %v818_v56 = vld [vmem:[#allocation3 + $0xa0] sm:$0xff] }
  0xe8   : > { %648 = vmatprep.mubr.f32.mxu0 %v3419_v62  ;;  %728 = vmatprep.mubr.f32.mxu1 %v444_v6 }
  0xeb   : > { %649 = vmatmul.mubr.f32.gmra.mrb[30].mxu0 %v3420_v63  ;;  %729 = vmatmul.mubr.f32.gmra.mrb[30].mxu1 %v443_v60 }
 0x103   : > { %v832_v3 = vpop.xlane.xlu0 %831 }
 0x104   : > { %v838_v2 = vpop.xlane.xlu1 %837  ;;  %v926_v11 = vadd.f32 %v832_v3, %v798_v1  ;;  %v820_v3 = vld [vmem:[#allocation3 + $0xb0] sm:$0xff] }
 0x105   : > { %v928_v10 = vadd.f32 %v838_v2, %v800_v0  ;;  %v821_v2 = vld [vmem:[#allocation3 + $0xb8] sm:$0xff] }
 0x106   : > { %959 = vst.msk [vmem:[#allocation3] sm:$0xff] %vm958_vm1, %v926_v11 }
 0x107   : > { %961 = vst.msk [vmem:[#allocation3 + $0x10] sm:$0xff] %vm958_vm1, %v928_v10  ;;  %v835_v17 = vpop.xlane.xlu0 %834 }
 0x108   : > { %v841_v15 = vpop.xlane.xlu1 %840  ;;  %v927_v25 = vadd.f32 %v835_v17, %v799_v14  ;;  %v822_v17 = vld [vmem:[#allocation3 + $0xc0] sm:$0xff] }
 0x109   : > { %v929_v24 = vadd.f32 %v841_v15, %v801_v12  ;;  %v823_v15 = vld [vmem:[#allocation3 + $0xc8] sm:$0xff] }
 0x10a   : > { %960 = vst.msk [vmem:[#allocation3 + $0x8] sm:$0xff] %vm958_vm1, %v927_v25 }
 0x10b   : > { %962 = vst.msk [vmem:[#allocation3 + $0x18] sm:$0xff] %vm958_vm1, %v929_v24  ;;  %v844_v48 = vpop.xlane.xlu0 %843 }
 0x10c   : > { %v847_v35 = vpop.xlane.xlu1 %846  ;;  %v930_v50 = vadd.f32 %v844_v48, %v802_v29  ;;  %v824_v48 = vld [vmem:[#allocation3 + $0xd0] sm:$0xff] }
 0x10d   : > { %v931_v49 = vadd.f32 %v847_v35, %v803_v27  ;;  %v825_v35 = vld [vmem:[#allocation3 + $0xd8] sm:$0xff] }
 0x10e   : > { %963 = vst.msk [vmem:[#allocation3 + $0x20] sm:$0xff] %vm958_vm1, %v930_v50 }
 0x10f   : > { %964 = vst.msk [vmem:[#allocation3 + $0x28] sm:$0xff] %vm958_vm1, %v931_v49  ;;  %v850_v21 = vpop.xlane.xlu0 %849 }
 0x110   : > { %v853_v5 = vpop.xlane.xlu1 %852  ;;  %v932_v38 = vadd.f32 %v850_v21, %v804_v58  ;;  %v826_v21 = vld [vmem:[#allocation3 + $0xe0] sm:$0xff] }
 0x111   : > { %v933_v22 = vadd.f32 %v853_v5, %v805_v57  ;;  %v827_v5 = vld [vmem:[#allocation3 + $0xe8] sm:$0xff] }
 0x112   : > { %965 = vst.msk [vmem:[#allocation3 + $0x30] sm:$0xff] %vm958_vm1, %v932_v38 }
 0x113   : > { %966 = vst.msk [vmem:[#allocation3 + $0x38] sm:$0xff] %vm958_vm1, %v933_v22  ;;  %v856_v61 = vpop.xlane.xlu0 %855 }
 0x114   : > { %v859_v59 = vpop.xlane.xlu1 %858  ;;  %v934_v19 = vadd.f32 %v856_v61, %v806_v4  ;;  %v828_v61 = vld [vmem:[#allocation3 + $0xf0] sm:$0xff] }
 0x115   : > { %v935_v16 = vadd.f32 %v859_v59, %v807_v39  ;;  %v829_v59 = vld [vmem:[#allocation3 + $0xf8] sm:$0xff] }
 0x116   : > { %967 = vst.msk [vmem:[#allocation3 + $0x40] sm:$0xff] %vm958_vm1, %v934_v19 }
 0x117   : > { %968 = vst.msk [vmem:[#allocation3 + $0x48] sm:$0xff] %vm958_vm1, %v935_v16  ;;  %v862_v9 = vpop.xlane.xlu0 %861 }
 0x118   : > { %v936_v8 = vadd.f32 %v862_v9, %v808_v42  ;;  %v445_v9 = vld [vmem:[#allocation2] sm:$0xff] }
 0x11a   : > { %969 = vst.msk [vmem:[#allocation3 + $0x50] sm:$0xff] %vm958_vm1, %v936_v8 }
 0x11b   : > { %v865_v43 = vpop.xlane.xlu1 %864 }
 0x11c   : > { %v937_v37 = vadd.f32 %v865_v43, %v809_v36  ;;  %v461_v43 = vld [vmem:[#allocation2 + $0x80] sm:$0xff] }
 0x11e   : > { %970 = vst.msk [vmem:[#allocation3 + $0x58] sm:$0xff] %vm958_vm1, %v937_v37 }
 0x123   : > { %v871_v32 = vpop.xlane.xlu1 %870  ;;  %v868_v26 = vpop.xlane.xlu0 %867 }
 0x124   : > { %v939_v34 = vadd.f32 %v871_v32, %v811_v46  ;;  %v938_v40 = vadd.f32 %v868_v26, %v810_v13 }
 0x126   : > { %972 = vst.msk [vmem:[#allocation3 + $0x68] sm:$0xff] %vm958_vm1, %v939_v34  ;;  %971 = vst.msk [vmem:[#allocation3 + $0x60] sm:$0xff] %vm958_vm1, %v938_v40  ;;  %v462_v34 = vld [vmem:[#allocation2 + $0x88] sm:$0xff] }
 0x127   : > { %v874_v18 = vpop.xlane.xlu0 %873  ;;  %v446_v40 = vld [vmem:[#allocation2 + $0x8] sm:$0xff] }
 0x128   : > { %v940_v31 = vadd.f32 %v874_v18, %v812_v7 }
 0x12a   : > { %973 = vst.msk [vmem:[#allocation3 + $0x70] sm:$0xff] %vm958_vm1, %v940_v31 }
 0x12b   : > { %v877_v20 = vpop.xlane.xlu1 %876 }
 0x12c   : > { %v941_v30 = vadd.f32 %v877_v20, %v813_v47 }
 0x12e   : > { %974 = vst.msk [vmem:[#allocation3 + $0x78] sm:$0xff] %vm958_vm1, %v941_v30 }
 0x133   : > { %v883_v28 = vpop.xlane.xlu1 %882  ;;  %v880_v6 = vpop.xlane.xlu0 %879 }
 0x134   : > { %v943_v60 = vadd.f32 %v883_v28, %v815_v41  ;;  %v942_v23 = vadd.f32 %v880_v6, %v814_v51  ;;  %v463_v41 = vld [vmem:[#allocation2 + $0x90] sm:$0xff] }
 0x135   : > { %v447_v51 = vld [vmem:[#allocation2 + $0x10] sm:$0xff] }
 0x136   : > { %976 = vst.msk [vmem:[#allocation3 + $0x88] sm:$0xff] %vm958_vm1, %v943_v60  ;;  %975 = vst.msk [vmem:[#allocation3 + $0x80] sm:$0xff] %vm958_vm1, %v942_v23 }
 0x137   : > { %v889_v45 = vpop.xlane.xlu1 %888  ;;  %v886_v52 = vpop.xlane.xlu0 %885 }
 0x138   : > { %v945_v53 = vadd.f32 %v889_v45, %v817_v33  ;;  %v944_v54 = vadd.f32 %v886_v52, %v816_v44  ;;  %v464_v45 = vld [vmem:[#allocation2 + $0x98] sm:$0xff] }
 0x139   : > { %v448_v52 = vld [vmem:[#allocation2 + $0x18] sm:$0xff] }
 0x13a   : > { %978 = vst.msk [vmem:[#allocation3 + $0x98] sm:$0xff] %vm958_vm1, %v945_v53  ;;  %977 = vst.msk [vmem:[#allocation3 + $0x90] sm:$0xff] %vm958_vm1, %v944_v54 }
 0x13b   : > { %v895_v62 = vpop.xlane.xlu1 %894  ;;  %v892_v63 = vpop.xlane.xlu0 %891 }
 0x13c   : > { %v947_v0 = vadd.f32 %v895_v62, %v819_v55  ;;  %v946_v1 = vadd.f32 %v892_v63, %v818_v56 }
 0x13e   : > { %980 = vst.msk [vmem:[#allocation3 + $0xa8] sm:$0xff] %vm958_vm1, %v947_v0  ;;  %979 = vst.msk [vmem:[#allocation3 + $0xa0] sm:$0xff] %vm958_vm1, %v946_v1  ;;  %v465_v0 = vld [vmem:[#allocation2 + $0xa0] sm:$0xff] }
 0x13f   : > { %v901_v10 = vpop.xlane.xlu1 %900  ;;  %v898_v11 = vpop.xlane.xlu0 %897  ;;  %v449_v1 = vld [vmem:[#allocation2 + $0x20] sm:$0xff] }
 0x140   : > { %v949_v12 = vadd.f32 %v901_v10, %v821_v2  ;;  %v948_v14 = vadd.f32 %v898_v11, %v820_v3 }
 0x142   : > { %982 = vst.msk [vmem:[#allocation3 + $0xb8] sm:$0xff] %vm958_vm1, %v949_v12  ;;  %981 = vst.msk [vmem:[#allocation3 + $0xb0] sm:$0xff] %vm958_vm1, %v948_v14 }
 0x143   : > { %v907_v24 = vpop.xlane.xlu1 %906  ;;  %v904_v25 = vpop.xlane.xlu0 %903 }
 0x144   : > { %v951_v27 = vadd.f32 %v907_v24, %v823_v15  ;;  %v950_v29 = vadd.f32 %v904_v25, %v822_v17  ;;  %v466_v15 = vld [vmem:[#allocation2 + $0xa8] sm:$0xff] }
 0x145   : > { %v450_v17 = vld [vmem:[#allocation2 + $0x28] sm:$0xff] }
 0x146   : > { %984 = vst.msk [vmem:[#allocation3 + $0xc8] sm:$0xff] %vm958_vm1, %v951_v27  ;;  %983 = vst.msk [vmem:[#allocation3 + $0xc0] sm:$0xff] %vm958_vm1, %v950_v29 }
 0x147   : > { %v913_v49 = vpop.xlane.xlu1 %912  ;;  %v910_v50 = vpop.xlane.xlu0 %909 }
 0x148   : > { %v953_v57 = vadd.f32 %v913_v49, %v825_v35  ;;  %v952_v58 = vadd.f32 %v910_v50, %v824_v48  ;;  %v467_v49 = vld [vmem:[#allocation2 + $0xb0] sm:$0xff] }
 0x149   : > { %v451_v50 = vld [vmem:[#allocation2 + $0x30] sm:$0xff] }
 0x14a   : > { %986 = vst.msk [vmem:[#allocation3 + $0xd8] sm:$0xff] %vm958_vm1, %v953_v57  ;;  %985 = vst.msk [vmem:[#allocation3 + $0xd0] sm:$0xff] %vm958_vm1, %v952_v58 }
 0x14b   : > { %v919_v22 = vpop.xlane.xlu1 %918  ;;  %v916_v38 = vpop.xlane.xlu0 %915 }
 0x14c   : > { %v955_v39 = vadd.f32 %v919_v22, %v827_v5  ;;  %v954_v4 = vadd.f32 %v916_v38, %v826_v21 }
 0x14e   : > { %988 = vst.msk [vmem:[#allocation3 + $0xe8] sm:$0xff] %vm958_vm1, %v955_v39  ;;  %987 = vst.msk [vmem:[#allocation3 + $0xe0] sm:$0xff] %vm958_vm1, %v954_v4  ;;  %v468_v39 = vld [vmem:[#allocation2 + $0xb8] sm:$0xff] }
 0x14f   : > { %v925_v16 = vpop.xlane.xlu1 %924  ;;  %v922_v19 = vpop.xlane.xlu0 %921  ;;  %v452_v4 = vld [vmem:[#allocation2 + $0x38] sm:$0xff] }
 0x150   : > { %v957_v36 = vadd.f32 %v925_v16, %v829_v59  ;;  %v956_v42 = vadd.f32 %v922_v19, %v828_v61 }
 0x152   : > { %990 = vst.msk [vmem:[#allocation3 + $0xf8] sm:$0xff] %vm958_vm1, %v957_v36  ;;  %989 = vst.msk [vmem:[#allocation3 + $0xf0] sm:$0xff] %vm958_vm1, %v956_v42 }
 0x182   : > { %v655_v37 = vpop.f32.mrb[0].mxu1  ;;  %v575_v8 = vpop.f32.mrb[0].mxu0 }
 0x183   : > { %v750_v46 = vadd.f32 %v655_v37, %v461_v43  ;;  %v734_v13 = vadd.f32 %v575_v8, %v445_v9  ;;  %v577_v32 = vpop.f32.mrb[1].mxu0  ;;  %v657_v26 = vpop.f32.mrb[1].mxu1  ;;  %v469_v43 = vld [vmem:[#allocation2 + $0xc0] sm:$0xff] }
 0x184   : > { %v453_v9 = vld [vmem:[#allocation2 + $0x40] sm:$0xff] }
 0x185   : > { %782 = vst [vmem:[#allocation2 + $0x80] sm:$0xff] %v750_v46  ;;  %766 = vst [vmem:[#allocation2] sm:$0xff] %v734_v13 }
 0x186   : > { %v660_v47 = vpop.f32.mrb[2].mxu1  ;;  %v580_v7 = vpop.f32.mrb[2].mxu0 }
 0x187   : > { %v751_v20 = vadd.f32 %v660_v47, %v462_v34  ;;  %v735_v18 = vadd.f32 %v580_v7, %v446_v40  ;;  %v582_v30 = vpop.f32.mrb[3].mxu0  ;;  %v662_v31 = vpop.f32.mrb[3].mxu1  ;;  %v470_v34 = vld [vmem:[#allocation2 + $0xc8] sm:$0xff] }
 0x188   : > { %v454_v40 = vld [vmem:[#allocation2 + $0x48] sm:$0xff] }
 0x189   : > { %783 = vst [vmem:[#allocation2 + $0x88] sm:$0xff] %v751_v20  ;;  %767 = vst [vmem:[#allocation2 + $0x8] sm:$0xff] %v735_v18 }
 0x18a   : > { %v665_v28 = vpop.f32.mrb[4].mxu1  ;;  %v585_v6 = vpop.f32.mrb[4].mxu0 }
 0x18b   : > { %v752_v60 = vadd.f32 %v665_v28, %v463_v41  ;;  %v736_v23 = vadd.f32 %v585_v6, %v447_v51  ;;  %v587_v33 = vpop.f32.mrb[5].mxu0  ;;  %v667_v44 = vpop.f32.mrb[5].mxu1  ;;  %v471_v41 = vld [vmem:[#allocation2 + $0xd0] sm:$0xff] }
 0x18c   : > { %v455_v51 = vld [vmem:[#allocation2 + $0x50] sm:$0xff] }
 0x18d   : > { %784 = vst [vmem:[#allocation2 + $0x90] sm:$0xff] %v752_v60  ;;  %768 = vst [vmem:[#allocation2 + $0x10] sm:$0xff] %v736_v23 }
 0x18e   : > { %v670_v53 = vpop.f32.mrb[6].mxu1  ;;  %v590_v54 = vpop.f32.mrb[6].mxu0 }
 0x18f   : > { %v753_v55 = vadd.f32 %v670_v53, %v464_v45  ;;  %v737_v56 = vadd.f32 %v590_v54, %v448_v52  ;;  %v592_v62 = vpop.f32.mrb[7].mxu0  ;;  %v672_v63 = vpop.f32.mrb[7].mxu1  ;;  %v472_v45 = vld [vmem:[#allocation2 + $0xd8] sm:$0xff] }
 0x190   : > { %v456_v52 = vld [vmem:[#allocation2 + $0x58] sm:$0xff] }
 0x191   : > { %785 = vst [vmem:[#allocation2 + $0x98] sm:$0xff] %v753_v55  ;;  %769 = vst [vmem:[#allocation2 + $0x18] sm:$0xff] %v737_v56 }
 0x192   : > { %v675_v2 = vpop.f32.mrb[8].mxu1  ;;  %v595_v3 = vpop.f32.mrb[8].mxu0 }
 0x193   : > { %v754_v10 = vadd.f32 %v675_v2, %v465_v0  ;;  %v738_v11 = vadd.f32 %v595_v3, %v449_v1  ;;  %v597_v12 = vpop.f32.mrb[9].mxu0  ;;  %v677_v14 = vpop.f32.mrb[9].mxu1  ;;  %v473_v0 = vld [vmem:[#allocation2 + $0xe0] sm:$0xff] }
 0x194   : > { %v457_v1 = vld [vmem:[#allocation2 + $0x60] sm:$0xff] }
 0x195   : > { %786 = vst [vmem:[#allocation2 + $0xa0] sm:$0xff] %v754_v10  ;;  %770 = vst [vmem:[#allocation2 + $0x20] sm:$0xff] %v738_v11 }
 0x196   : > { %v680_v24 = vpop.f32.mrb[10].mxu1  ;;  %v600_v25 = vpop.f32.mrb[10].mxu0 }
 0x197   : > { %v755_v27 = vadd.f32 %v680_v24, %v466_v15  ;;  %v739_v29 = vadd.f32 %v600_v25, %v450_v17  ;;  %v602_v35 = vpop.f32.mrb[11].mxu0  ;;  %v682_v48 = vpop.f32.mrb[11].mxu1  ;;  %v474_v15 = vld [vmem:[#allocation2 + $0xe8] sm:$0xff] }
 0x198   : > { %v458_v17 = vld [vmem:[#allocation2 + $0x68] sm:$0xff] }
 0x199   : > { %787 = vst [vmem:[#allocation2 + $0xa8] sm:$0xff] %v755_v27  ;;  %771 = vst [vmem:[#allocation2 + $0x28] sm:$0xff] %v739_v29 }
 0x19a   : > { %v685_v57 = vpop.f32.mrb[12].mxu1  ;;  %v605_v58 = vpop.f32.mrb[12].mxu0 }
 0x19b   : > { %v756_v5 = vadd.f32 %v685_v57, %v467_v49  ;;  %v740_v21 = vadd.f32 %v605_v58, %v451_v50  ;;  %v607_v22 = vpop.f32.mrb[13].mxu0  ;;  %v687_v38 = vpop.f32.mrb[13].mxu1  ;;  %v475_v49 = vld [vmem:[#allocation2 + $0xf0] sm:$0xff] }
 0x19c   : > { %v459_v50 = vld [vmem:[#allocation2 + $0x70] sm:$0xff] }
 0x19d   : > { %788 = vst [vmem:[#allocation2 + $0xb0] sm:$0xff] %v756_v5  ;;  %772 = vst [vmem:[#allocation2 + $0x30] sm:$0xff] %v740_v21 }
 0x19e   : > { %v690_v59 = vpop.f32.mrb[14].mxu1  ;;  %v610_v61 = vpop.f32.mrb[14].mxu0 }
 0x19f   : > { %v757_v16 = vadd.f32 %v690_v59, %v468_v39  ;;  %v741_v19 = vadd.f32 %v610_v61, %v452_v4  ;;  %v612_v36 = vpop.f32.mrb[15].mxu0  ;;  %v692_v42 = vpop.f32.mrb[15].mxu1  ;;  %v476_v39 = vld [vmem:[#allocation2 + $0xf8] sm:$0xff] }
 0x1a0   : > { %v460_v4 = vld [vmem:[#allocation2 + $0x78] sm:$0xff] }
 0x1a1   : > { %789 = vst [vmem:[#allocation2 + $0xb8] sm:$0xff] %v757_v16  ;;  %773 = vst [vmem:[#allocation2 + $0x38] sm:$0xff] %v741_v19 }
 0x1a2   : > { %v695_v37 = vpop.f32.mrb[16].mxu1  ;;  %v615_v8 = vpop.f32.mrb[16].mxu0 }
 0x1a3   : > { %v758_v46 = vadd.f32 %v695_v37, %v469_v43  ;;  %v742_v13 = vadd.f32 %v615_v8, %v453_v9  ;;  %v617_v32 = vpop.f32.mrb[17].mxu0  ;;  %v697_v26 = vpop.f32.mrb[17].mxu1  ;;  %v1347_v43 = vld [vmem:[%s3387_s3] sm:$0xff] (!%p1879_p4)  ;;  %v1348_v9 = vld [vmem:[%s3387_s3 + $0x8] sm:$0xff] (!%p1879_p4)  ;;  %v1349_v37 = vld [vmem:[%s3387_s3 + $0x10] sm:$0xff] (!%p1879_p4) }
 0x1a4   : > { %v2059_v8 = vpack.c.bf16 (!%p1879_p4), %v1348_v9, %v1347_v43  ;;  %v1331_v32 = vld [vmem:[%s2630_s13 + $0x80] sm:$0xff] (!%p1879_p4)  ;;  %v2439_v26 = vmov (!%p1879_p4), 0   ;;  %v1009_v9 = vld [vmem:[#allocation3 + $0x70] sm:$0xff] (!%p1879_p4) }
 0x1a5   : > { %790 = vst [vmem:[#allocation2 + $0xc0] sm:$0xff] %v758_v46  ;;  %774 = vst [vmem:[#allocation2 + $0x40] sm:$0xff] %v742_v13  ;;  %v1350_v46 = vld [vmem:[%s3387_s3 + $0x18] sm:$0xff] (!%p1879_p4)  ;;  %v1315_v13 = vld [vmem:[%s2630_s13] sm:$0xff] (!%p1879_p4)  ;;  %2214 = vset.pattern.permute.xlu1 (!%p1879_p4), %v2439_v26  ;;  %2213 = vset.pattern.permute.xlu0 (!%p1879_p4), %v2439_v26 }
 0x1a6   : > { %v700_v47 = vpop.f32.mrb[18].mxu1  ;;  %v620_v7 = vpop.f32.mrb[18].mxu0  ;;  %1963 = vmatprep.mubr.msk.f32.mxu0 (!%p1879_p4), %vm1351_vm2, %v1315_v13  ;;  %1987 = vmatprep.mubr.msk.f32.mxu1 (!%p1879_p4), %vm1351_vm2, %v1331_v32  ;;  %v1327_v32 = vld [vmem:[%s2630_s13 + $0x60] sm:$0xff] (!%p1879_p4) }
 0x1a7   : > { %v759_v20 = vadd.f32 %v700_v47, %v470_v34  ;;  %v743_v18 = vadd.f32 %v620_v7, %v454_v40  ;;  %v622_v30 = vpop.f32.mrb[19].mxu0  ;;  %v702_v31 = vpop.f32.mrb[19].mxu1  ;;  %v2063_v34 = vpack.c.bf16 (!%p1879_p4), %v1350_v46, %v1349_v37  ;;  %2060 = vmatprep.subr.bf16.mxu0 (!%p1879_p4), %v2059_v8  ;;  %2099 = vmatprep.subr.bf16.mxu1 (!%p1879_p4), %v2059_v8  ;;  %v997_v40 = vld [vmem:[#allocation3 + $0x10] sm:$0xff] (!%p1879_p4)  ;;  %v995_v47 = vld [vmem:[#allocation3] sm:$0xff] (!%p1879_p4)  ;;  %v1342_v46 = vld [vmem:[%s2630_s13 + $0xd8] sm:$0xff] (!%p1879_p4) }
 0x1a8   : > { %2062 = vmatpush3.bf16.msra.mxu0 (!%p1879_p4), %v2059_v8  ;;  %2101 = vmatpush3.bf16.msra.mxu1 (!%p1879_p4), %v2059_v8  ;;  %v1029_v7 = vadd.f32 (!%p1879_p4), 1.0, %v997_v40  ;;  %v996_v30 = vld [vmem:[#allocation3 + $0x8] sm:$0xff] (!%p1879_p4)  ;;  %v1326_v8 = vld [vmem:[%s2630_s13 + $0x58] sm:$0xff] (!%p1879_p4)  ;;  %v1343_v26 = vld [vmem:[%s2630_s13 + $0xe0] sm:$0xff] (!%p1879_p4) }
 0x1a9   : > { %791 = vst [vmem:[#allocation2 + $0xc8] sm:$0xff] %v759_v20  ;;  %775 = vst [vmem:[#allocation2 + $0x48] sm:$0xff] %v743_v18  ;;  %v1027_v20 = vadd.f32 (!%p1879_p4), 1.0, %v995_v47  ;;  %2064 = vmatprep.subr.bf16.mxu0 (!%p1879_p4), %v2063_v34  ;;  %2100 = vmatprep.subr.bf16.mxu1 (!%p1879_p4), %v2063_v34  ;;  %v998_v18 = vld [vmem:[#allocation3 + $0x18] sm:$0xff] (!%p1879_p4)  ;;  %v1012_v40 = vld [vmem:[#allocation3 + $0x88] sm:$0xff] (!%p1879_p4) }
 0x1aa   : > { %v705_v28 = vpop.f32.mrb[20].mxu1  ;;  %v625_v6 = vpop.f32.mrb[20].mxu0  ;;  %2215 = vrcp.f32 (!%p1879_p4), %v1029_v7  ;;  %v1030_v31 = vadd.f32 (!%p1879_p4), 1.0, %v998_v18  ;;  %v1011_v7 = vld [vmem:[#allocation3 + $0x80] sm:$0xff] (!%p1879_p4)  ;;  %v1328_v18 = vld [vmem:[%s2630_s13 + $0x68] sm:$0xff] (!%p1879_p4) }
 0x1ab   : > { %v760_v60 = vadd.f32 %v705_v28, %v471_v41  ;;  %v744_v23 = vadd.f32 %v625_v6, %v455_v51  ;;  %v627_v33 = vpop.f32.mrb[21].mxu0  ;;  %v707_v44 = vpop.f32.mrb[21].mxu1  ;;  %v1028_v41 = vadd.f32 (!%p1879_p4), 1.0, %v996_v30  ;;  %2217 = vrcp.f32 (!%p1879_p4), %v1027_v20  ;;  %v1000_v51 = vld [vmem:[#allocation3 + $0x28] sm:$0xff] (!%p1879_p4)  ;;  %v999_v28 = vld [vmem:[#allocation3 + $0x20] sm:$0xff] (!%p1879_p4) }
 0x1ac   : > { %2066 = vmatpush3.bf16.msra.mxu0 (!%p1879_p4), %v2063_v34  ;;  %2102 = vmatpush3.bf16.msra.mxu1 (!%p1879_p4), %v2063_v34  ;;  %v1316_v6 = vld [vmem:[%s2630_s13 + $0x8] sm:$0xff] (!%p1879_p4)  ;;  %2219 = vrcp.f32 (!%p1879_p4), %v1030_v31  ;;  %v1317_v33 = vld [vmem:[%s2630_s13 + $0x10] sm:$0xff] (!%p1879_p4)  ;;  %v1041_v34 = vadd.f32 (!%p1879_p4), 1.0, %v1009_v9  ;;  %v1044_v31 = vadd.f32 (!%p1879_p4), 1.0, %v1012_v40 }
 0x1ad   : > { %792 = vst [vmem:[#allocation2 + $0xd0] sm:$0xff] %v760_v60  ;;  %776 = vst [vmem:[#allocation2 + $0x50] sm:$0xff] %v744_v23  ;;  %v1332_v60 = vld [vmem:[%s2630_s13 + $0x88] sm:$0xff] (!%p1879_p4)  ;;  %v1032_v23 = vadd.f32 (!%p1879_p4), 1.0, %v1000_v51  ;;  %v1333_v44 = vld [vmem:[%s2630_s13 + $0x90] sm:$0xff] (!%p1879_p4)  ;;  %2221 = vrcp.f32 (!%p1879_p4), %v1028_v41 }
 0x1ae   : > { %v710_v53 = vpop.f32.mrb[22].mxu1  ;;  %v630_v54 = vpop.f32.mrb[22].mxu0  ;;  %v1344_v30 = vld [vmem:[%s2630_s13 + $0xe8] sm:$0xff] (!%p1879_p4)  ;;  %v1329_v41 = vld [vmem:[%s2630_s13 + $0x70] sm:$0xff] (!%p1879_p4) }
 0x1af   : > { %v761_v55 = vadd.f32 %v710_v53, %v472_v45  ;;  %v745_v56 = vadd.f32 %v630_v54, %v456_v52  ;;  %v632_v62 = vpop.f32.mrb[23].mxu0  ;;  %v712_v63 = vpop.f32.mrb[23].mxu1  ;;  %v1031_v45 = vadd.f32 (!%p1879_p4), 1.0, %v999_v28  ;;  %v1002_v52 = vld [vmem:[#allocation3 + $0x38] sm:$0xff] (!%p1879_p4)  ;;  %v1001_v53 = vld [vmem:[#allocation3 + $0x30] sm:$0xff] (!%p1879_p4)  ;;  %1964 = vmatmul.mubr.msk.f32.vlgmr.msra.gmra.mrb[0].mxu0 (!%p1879_p4), %vm1351_vm2, %v1316_v6  ;;  %1988 = vmatmul.mubr.msk.f32.vlgmr.msra.gmra.mrb[0].mxu1 (!%p1879_p4), %vm1351_vm2, %v1332_v60  ;;  %2223 = vrcp.f32 (!%p1879_p4), %v1032_v23 }
 0x1b0   : > { %1966 = vmatprep.mubr.msk.f32.mxu0 (!%p1879_p4), %vm1351_vm2, %v1317_v33  ;;  %1990 = vmatprep.mubr.msk.f32.mxu1 (!%p1879_p4), %vm1351_vm2, %v1333_v44  ;;  %v1318_v54 = vld [vmem:[%s2630_s13 + $0x18] sm:$0xff] (!%p1879_p4)  ;;  %v1319_v62 = vld [vmem:[%s2630_s13 + $0x20] sm:$0xff] (!%p1879_p4)  ;;  %v1345_v51 = vld [vmem:[%s2630_s13 + $0xf0] sm:$0xff] (!%p1879_p4)  ;;  %v1043_v28 = vadd.f32 (!%p1879_p4), 1.0, %v1011_v7 }
 0x1b1   : > { %793 = vst [vmem:[#allocation2 + $0xd8] sm:$0xff] %v761_v55  ;;  %777 = vst [vmem:[#allocation2 + $0x58] sm:$0xff] %v745_v56  ;;  %v1334_v55 = vld [vmem:[%s2630_s13 + $0x98] sm:$0xff] (!%p1879_p4)  ;;  %v1034_v56 = vadd.f32 (!%p1879_p4), 1.0, %v1002_v52  ;;  %v1335_v63 = vld [vmem:[%s2630_s13 + $0xa0] sm:$0xff] (!%p1879_p4)  ;;  %2225 = vrcp.f32 (!%p1879_p4), %v1031_v45 }
 0x1b2   : > { %v715_v2 = vpop.f32.mrb[24].mxu1  ;;  %v635_v3 = vpop.f32.mrb[24].mxu0  ;;  %v1014_v6 = vld [vmem:[#allocation3 + $0x98] sm:$0xff] (!%p1879_p4)  ;;  %v1013_v23 = vld [vmem:[#allocation3 + $0x90] sm:$0xff] (!%p1879_p4) }
 0x1b3   : > { %v762_v10 = vadd.f32 %v715_v2, %v473_v0  ;;  %v746_v11 = vadd.f32 %v635_v3, %v457_v1  ;;  %v637_v12 = vpop.f32.mrb[25].mxu0  ;;  %v717_v14 = vpop.f32.mrb[25].mxu1  ;;  %v1033_v0 = vadd.f32 (!%p1879_p4), 1.0, %v1001_v53  ;;  %v1004_v1 = vld [vmem:[#allocation3 + $0x48] sm:$0xff] (!%p1879_p4)  ;;  %v1003_v2 = vld [vmem:[#allocation3 + $0x40] sm:$0xff] (!%p1879_p4)  ;;  %1967 = vmatmul.mubr.msk.f32.gmra.mrb[2].mxu0 (!%p1879_p4), %vm1351_vm2, %v1318_v54  ;;  %1991 = vmatmul.mubr.msk.f32.gmra.mrb[2].mxu1 (!%p1879_p4), %vm1351_vm2, %v1334_v55  ;;  %2227 = vrcp.f32 (!%p1879_p4), %v1034_v56  ;;  %v1330_v44 = vld [vmem:[%s2630_s13 + $0x78] sm:$0xff] (!%p1879_p4) }
 0x1b4   : > { %v2216_v3 = vpop.eup (!%p1879_p4), %2215  ;;  %1969 = vmatprep.mubr.msk.f32.mxu0 (!%p1879_p4), %vm1351_vm2, %v1319_v62  ;;  %1993 = vmatprep.mubr.msk.f32.mxu1 (!%p1879_p4), %vm1351_vm2, %v1335_v63  ;;  %v1036_v12 = vadd.f32 (!%p1879_p4), 1.0, %v1004_v1  ;;  %v1346_v45 = vld [vmem:[%s2630_s13 + $0xf8] sm:$0xff] (!%p1879_p4)  ;;  %v1046_v52 = vadd.f32 (!%p1879_p4), 1.0, %v1014_v6  ;;  %v1045_v53 = vadd.f32 (!%p1879_p4), 1.0, %v1013_v23  ;;  %v1016_v54 = vld [vmem:[#allocation3 + $0xa8] sm:$0xff] (!%p1879_p4)  ;;  %v1015_v56 = vld [vmem:[#allocation3 + $0xa0] sm:$0xff] (!%p1879_p4) }
 0x1b5   : > { %794 = vst [vmem:[#allocation2 + $0xe0] sm:$0xff] %v762_v10  ;;  %778 = vst [vmem:[#allocation2 + $0x60] sm:$0xff] %v746_v11  ;;  %v1320_v10 = vld [vmem:[%s2630_s13 + $0x28] sm:$0xff] (!%p1879_p4)  ;;  %v2218_v14 = vpop.eup (!%p1879_p4), %2217  ;;  %1135 = vperm.xlu1 (!%p1879_p4), %2214, %v2216_v3   ;;  %2229 = vrcp.f32 (!%p1879_p4), %v1033_v0  ;;  %v1048_v63 = vadd.f32 (!%p1879_p4), 1.0, %v1016_v54  ;;  %v1047_v0 = vadd.f32 (!%p1879_p4), 1.0, %v1015_v56  ;;  %v1018_v1 = vld [vmem:[#allocation3 + $0xb8] sm:$0xff] (!%p1879_p4) }
 0x1b6   : > { %v720_v24 = vpop.f32.mrb[26].mxu1  ;;  %v640_v25 = vpop.f32.mrb[26].mxu0  ;;  %v1336_v11 = vld [vmem:[%s2630_s13 + $0xa8] sm:$0xff] (!%p1879_p4)  ;;  %1125 = vperm.xlu0 (!%p1879_p4), %2213, %v2218_v14   ;;  %2231 = vrcp.f32 (!%p1879_p4), %v1036_v12  ;;  %v1017_v3 = vld [vmem:[#allocation3 + $0xb0] sm:$0xff] (!%p1879_p4) }
 0x1b7   : > { %v763_v27 = vadd.f32 %v720_v24, %v474_v15  ;;  %v747_v29 = vadd.f32 %v640_v25, %v458_v17  ;;  %v642_v35 = vpop.f32.mrb[27].mxu0  ;;  %v722_v48 = vpop.f32.mrb[27].mxu1  ;;  %v1321_v15 = vld [vmem:[%s2630_s13 + $0x30] sm:$0xff] (!%p1879_p4)  ;;  %v1035_v24 = vadd.f32 (!%p1879_p4), 1.0, %v1003_v2  ;;  %v1006_v25 = vld [vmem:[#allocation3 + $0x58] sm:$0xff] (!%p1879_p4)  ;;  %1970 = vmatmul.mubr.msk.f32.gmra.mrb[4].mxu0 (!%p1879_p4), %vm1351_vm2, %v1320_v10  ;;  %1994 = vmatmul.mubr.msk.f32.gmra.mrb[4].mxu1 (!%p1879_p4), %vm1351_vm2, %v1336_v11  ;;  %v1050_v11 = vadd.f32 (!%p1879_p4), 1.0, %v1018_v1 }
 0x1b8   : > { %v1337_v17 = vld [vmem:[%s2630_s13 + $0xb0] sm:$0xff] (!%p1879_p4)  ;;  %1972 = vmatprep.mubr.msk.f32.mxu0 (!%p1879_p4), %vm1351_vm2, %v1321_v15  ;;  %v1322_v48 = vld [vmem:[%s2630_s13 + $0x38] sm:$0xff] (!%p1879_p4)  ;;  %v1049_v12 = vadd.f32 (!%p1879_p4), 1.0, %v1017_v3  ;;  %v1020_v14 = vld [vmem:[#allocation3 + $0xc8] sm:$0xff] (!%p1879_p4) }
 0x1b9   : > { %795 = vst [vmem:[#allocation2 + $0xe8] sm:$0xff] %v763_v27  ;;  %779 = vst [vmem:[#allocation2 + $0x68] sm:$0xff] %v747_v29  ;;  %v2220_v27 = vpop.eup (!%p1879_p4), %2219  ;;  %v1005_v29 = vld [vmem:[#allocation3 + $0x50] sm:$0xff] (!%p1879_p4)  ;;  %1996 = vmatprep.mubr.msk.f32.mxu1 (!%p1879_p4), %vm1351_vm2, %v1337_v17  ;;  %2233 = vrcp.f32 (!%p1879_p4), %v1035_v24  ;;  %v1019_v17 = vld [vmem:[#allocation3 + $0xc0] sm:$0xff] (!%p1879_p4) }
 0x1ba   : > { %v725_v57 = vpop.f32.mrb[28].mxu1  ;;  %v645_v58 = vpop.f32.mrb[28].mxu0  ;;  %1140 = vperm.xlu1 (!%p1879_p4), %2214, %v2220_v27   ;;  %v1051_v27 = vadd.f32 (!%p1879_p4), 1.0, %v1019_v17  ;;  %v1091_v1 = vld [vmem:[#allocation2] sm:$0xff] (!%p1879_p4) }
 0x1bb   : > { %v764_v5 = vadd.f32 %v725_v57, %v475_v49  ;;  %v748_v21 = vadd.f32 %v645_v58, %v459_v50  ;;  %v647_v22 = vpop.f32.mrb[29].mxu0  ;;  %v727_v38 = vpop.f32.mrb[29].mxu1  ;;  %994 = sbr.rel (%p1879_p4) target bundleno = 677 (0x2a5), region = 48  ;;  %v1338_v49 = vld [vmem:[%s2630_s13 + $0xb8] sm:$0xff] (!%p1879_p4)  ;;  %v1038_v50 = vadd.f32 (!%p1879_p4), 1.0, %v1006_v25  ;;  %v1323_v57 = vld [vmem:[%s2630_s13 + $0x40] sm:$0xff] (!%p1879_p4)  ;;  %1973 = vmatmul.mubr.msk.f32.gmra.mrb[6].mxu0 (!%p1879_p4), %vm1351_vm2, %v1322_v48 }
 0x1bc   : > { %v2222_v35 = vpop.eup (!%p1879_p4), %2221  ;;  %v1339_v58 = vld [vmem:[%s2630_s13 + $0xc0] sm:$0xff] (!%p1879_p4)  ;;  %1997 = vmatmul.mubr.msk.f32.gmra.mrb[6].mxu1 (!%p1879_p4), %vm1351_vm2, %v1338_v49  ;;  %1975 = vmatprep.mubr.msk.f32.mxu0 (!%p1879_p4), %vm1351_vm2, %v1323_v57  ;;  %v1052_v25 = vadd.f32 (!%p1879_p4), 1.0, %v1020_v14  ;;  %v1021_v48 = vld [vmem:[#allocation3 + $0xd0] sm:$0xff] (!%p1879_p4) }
 0x1bd   : > { %796 = vst [vmem:[#allocation2 + $0xf0] sm:$0xff] %v764_v5  ;;  %780 = vst [vmem:[#allocation2 + $0x70] sm:$0xff] %v748_v21  ;;  %v1037_v5 = vadd.f32 (!%p1879_p4), 1.0, %v1005_v29  ;;  %v1008_v21 = vld [vmem:[#allocation3 + $0x68] sm:$0xff] (!%p1879_p4)  ;;  %v2224_v22 = vpop.eup (!%p1879_p4), %2223  ;;  %1130 = vperm.xlu0 (!%p1879_p4), %2213, %v2222_v35   ;;  %v1007_v38 = vld [vmem:[#allocation3 + $0x60] sm:$0xff] (!%p1879_p4)  ;;  %1999 = vmatprep.mubr.msk.f32.mxu1 (!%p1879_p4), %vm1351_vm2, %v1339_v58  ;;  %2235 = vrcp.f32 (!%p1879_p4), %v1038_v50  ;;  %v1053_v57 = vadd.f32 (!%p1879_p4), 1.0, %v1021_v48 }
 0x1be   : > { %v730_v59 = vpop.f32.mrb[30].mxu1  ;;  %v650_v61 = vpop.f32.mrb[30].mxu0  ;;  %1150 = vperm.xlu1 (!%p1879_p4), %2214, %v2224_v22   ;;  %v1022_v29 = vld [vmem:[#allocation3 + $0xd8] sm:$0xff] (!%p1879_p4)  ;;  %v1024_v58 = vld [vmem:[#allocation3 + $0xe8] sm:$0xff] (!%p1879_p4) }
 0x1bf   : > { %v765_v16 = vadd.f32 %v730_v59, %v476_v39  ;;  %v749_v19 = vadd.f32 %v650_v61, %v460_v4  ;;  %v652_v36 = vpop.f32.mrb[31].mxu0  ;;  %v732_v42 = vpop.f32.mrb[31].mxu1  ;;  %v1324_v4 = vld [vmem:[%s2630_s13 + $0x48] sm:$0xff] (!%p1879_p4)  ;;  %v1040_v61 = vadd.f32 (!%p1879_p4), 1.0, %v1008_v21  ;;  %2237 = vrcp.f32 (!%p1879_p4), %v1037_v5  ;;  %v1023_v21 = vld [vmem:[#allocation3 + $0xe0] sm:$0xff] (!%p1879_p4) }
 0x1c0   : > { %v2226_v39 = vpop.eup (!%p1879_p4), %2225  ;;  %v1340_v59 = vld [vmem:[%s2630_s13 + $0xc8] sm:$0xff] (!%p1879_p4)  ;;  %v1039_v36 = vadd.f32 (!%p1879_p4), 1.0, %v1007_v38  ;;  %v1010_v42 = vld [vmem:[#allocation3 + $0x78] sm:$0xff] (!%p1879_p4)  ;;  %1976 = vmatmul.mubr.msk.f32.gmra.mrb[8].mxu0 (!%p1879_p4), %vm1351_vm2, %v1324_v4  ;;  %v1054_v50 = vadd.f32 (!%p1879_p4), 1.0, %v1022_v29  ;;  %v1056_v38 = vadd.f32 (!%p1879_p4), 1.0, %v1024_v58  ;;  %v1093_v29 = vld [vmem:[#allocation2 + $0x10] sm:$0xff] (!%p1879_p4) }
 0x1c1   : > { %797 = vst [vmem:[#allocation2 + $0xf8] sm:$0xff] %v765_v16  ;;  %781 = vst [vmem:[#allocation2 + $0x78] sm:$0xff] %v749_v19  ;;  %v1325_v16 = vld [vmem:[%s2630_s13 + $0x50] sm:$0xff] (!%p1879_p4)  ;;  %v2228_v43 = vpop.eup (!%p1879_p4), %2227  ;;  %1145 = vperm.xlu0 (!%p1879_p4), %2213, %v2226_v39   ;;  %2000 = vmatmul.mubr.msk.f32.gmra.mrb[8].mxu1 (!%p1879_p4), %vm1351_vm2, %v1340_v59  ;;  %2239 = vrcp.f32 (!%p1879_p4), %v1040_v61  ;;  %v1042_v13 = vadd.f32 (!%p1879_p4), 1.0, %v1010_v42  ;;  %v1055_v39 = vadd.f32 (!%p1879_p4), 1.0, %v1023_v21  ;;  %v1026_v4 = vld [vmem:[#allocation3 + $0xf8] sm:$0xff] (!%p1879_p4) }
 0x1c2   : > { %v1341_v19 = vld [vmem:[%s2630_s13 + $0xd0] sm:$0xff]  ;;  %v2230_v37 = vpop.eup %2229  ;;  %1978 = vmatprep.mubr.msk.f32.mxu0 %vm1351_vm2, %v1325_v16  ;;  %1160 = vperm.xlu1 %2214, %v2228_v43   ;;  %2241 = vrcp.f32 %v1039_v36 }
 0x1c3   : > { %2002 = vmatprep.mubr.msk.f32.mxu1 %vm1351_vm2, %v1341_v19  ;;  %v2232_v47 = vpop.eup %2231  ;;  %2243 = vrcp.f32 %v1042_v13  ;;  %v1025_v61 = vld [vmem:[#allocation3 + $0xf0] sm:$0xff]  ;;  %v1058_v19 = vadd.f32 1.0, %v1026_v4 }
 0x1c4   : > { %v2234_v20 = vpop.eup %2233  ;;  %1979 = vmatmul.mubr.msk.f32.gmra.mrb[10].mxu0 %vm1351_vm2, %v1326_v8  ;;  %2245 = vrcp.f32 %v1041_v34  ;;  %v1057_v36 = vadd.f32 1.0, %v1025_v61 }
 0x1c5   : > { %1155 = vperm.xlu0 %2213, %v2230_v37   ;;  %2003 = vmatmul.mubr.msk.f32.gmra.mrb[10].mxu1 %vm1351_vm2, %v1342_v46  ;;  %2247 = vrcp.f32 %v1044_v31 }
 0x1c6   : > { %1981 = vmatprep.mubr.msk.f32.mxu0 %vm1351_vm2, %v1327_v32  ;;  %2005 = vmatprep.mubr.msk.f32.mxu1 %vm1351_vm2, %v1343_v26  ;;  %2249 = vrcp.f32 %v1043_v28 }
 0x1c7   : > { %1170 = vperm.xlu1 %2214, %v2232_v47   ;;  %v2236_v60 = vpop.eup %2235  ;;  %2251 = vrcp.f32 %v1046_v52 }
 0x1c8   : > { %1982 = vmatmul.mubr.msk.f32.gmra.mrb[12].mxu0 %vm1351_vm2, %v1328_v18  ;;  %2253 = vrcp.f32 %v1045_v53 }
 0x1c9   : > { %1165 = vperm.xlu0 %2213, %v2234_v20   ;;  %v2238_v33 = vpop.eup %2237  ;;  %2006 = vmatmul.mubr.msk.f32.gmra.mrb[12].mxu1 %vm1351_vm2, %v1344_v30  ;;  %2255 = vrcp.f32 %v1048_v63  ;;  %v1092_v63 = vld [vmem:[#allocation2 + $0x8] sm:$0xff] }
 0x1ca   : > { %1984 = vmatprep.mubr.msk.f32.mxu0 %vm1351_vm2, %v1329_v41  ;;  %2008 = vmatprep.mubr.msk.f32.mxu1 %vm1351_vm2, %v1345_v51  ;;  %2257 = vrcp.f32 %v1047_v0  ;;  %v1108_v0 = vld [vmem:[#allocation2 + $0x88] sm:$0xff] }
 0x1cb   : > { %1180 = vperm.xlu1 %2214, %v2236_v60   ;;  %v2240_v55 = vpop.eup %2239  ;;  %2259 = vrcp.f32 %v1050_v11 }
 0x1cc   : > { %v2242_v62 = vpop.eup %2241  ;;  %1985 = vmatmul.mubr.msk.f32.gmra.mrb[14].mxu0 %vm1351_vm2, %v1330_v44  ;;  %2261 = vrcp.f32 %v1049_v12 }
 0x1cd   : > { %1175 = vperm.xlu0 %2213, %v2238_v33   ;;  %2009 = vmatmul.mubr.msk.f32.gmra.mrb[14].mxu1 %vm1351_vm2, %v1346_v45  ;;  %v2244_v2 = vpop.eup %2243  ;;  %2263 = vrcp.f32 %v1052_v25 }
 0x1ce   : > { %v2246_v10 = vpop.eup %2245  ;;  %2265 = vrcp.f32 %v1051_v27 }
 0x1cf   : > { %1190 = vperm.xlu1 %2214, %v2240_v55   ;;  %v2248_v15 = vpop.eup %2247  ;;  %2267 = vrcp.f32 %v1054_v50 }
 0x1d0   : > { %v2250_v24 = vpop.eup %2249  ;;  %2269 = vrcp.f32 %v1053_v57 }
 0x1d1   : > { %1185 = vperm.xlu0 %2213, %v2242_v62   ;;  %v2252_v35 = vpop.eup %2251  ;;  %2271 = vrcp.f32 %v1056_v38 }
 0x1d2   : > { %v2254_v49 = vpop.eup %2253  ;;  %2273 = vrcp.f32 %v1055_v39  ;;  %v1096_v39 = vld [vmem:[#allocation2 + $0x28] sm:$0xff] }
 0x1d3   : > { %1200 = vperm.xlu1 %2214, %v2244_v2   ;;  %v2256_v5 = vpop.eup %2255  ;;  %2275 = vrcp.f32 %v1058_v19  ;;  %v1107_v2 = vld [vmem:[#allocation2 + $0x80] sm:$0xff] }
 0x1d4   : > { %v2258_v22 = vpop.eup %2257  ;;  %2277 = vrcp.f32 %v1057_v36  ;;  %v1095_v19 = vld [vmem:[#allocation2 + $0x20] sm:$0xff] }
 0x1d5   : > { %1195 = vperm.xlu0 %2213, %v2246_v10   ;;  %v2260_v59 = vpop.eup %2259  ;;  %v1111_v36 = vld [vmem:[#allocation2 + $0xa0] sm:$0xff] }
 0x1d6   : > { %v2262_v16 = vpop.eup %2261 }
 0x1d7   : > { %1210 = vperm.xlu1 %2214, %v2248_v15   ;;  %v2264_v42 = vpop.eup %2263  ;;  %v1094_v15 = vld [vmem:[#allocation2 + $0x18] sm:$0xff] }
 0x1d8   : > { %v2266_v43 = vpop.eup %2265 }
 0x1d9   : > { %1205 = vperm.xlu0 %2213, %v2250_v24   ;;  %v2268_v9 = vpop.eup %2267  ;;  %v1110_v24 = vld [vmem:[#allocation2 + $0x98] sm:$0xff] }
 0x1da   : > { %v2270_v37 = vpop.eup %2269 }
 0x1db   : > { %1220 = vperm.xlu1 %2214, %v2252_v35   ;;  %v2272_v8 = vpop.eup %2271  ;;  %v1109_v35 = vld [vmem:[#allocation2 + $0x90] sm:$0xff] }
 0x1dc   : > { %v2274_v46 = vpop.eup %2273 }
 0x1dd   : > { %1215 = vperm.xlu0 %2213, %v2254_v49   ;;  %v2276_v13 = vpop.eup %2275 }
 0x1de   : > { %v2278_v32 = vpop.eup %2277 }
 0x1df   : > { %1230 = vperm.xlu1 %2214, %v2256_v5  }
 0x1e1   : > { %1225 = vperm.xlu0 %2213, %v2258_v22  }
 0x1e3   : > { %1240 = vperm.xlu1 %2214, %v2260_v59   ;;  %v1112_v59 = vld [vmem:[#allocation2 + $0xa8] sm:$0xff] }
 0x1e5   : > { %1235 = vperm.xlu0 %2213, %v2262_v16  }
 0x1e7   : > { %1250 = vperm.xlu1 %2214, %v2264_v42  }
 0x1e9   : > { %1245 = vperm.xlu0 %2213, %v2266_v43  }
 0x1eb   : > { %1260 = vperm.xlu1 %2214, %v2268_v9  }
 0x1ed   : > { %1255 = vperm.xlu0 %2213, %v2270_v37  }
 0x1ef   : > { %1270 = vperm.xlu1 %2214, %v2272_v8  }
 0x1f1   : > { %1265 = vperm.xlu0 %2213, %v2274_v46  }
 0x1f3   : > { %1280 = vperm.xlu1 %2214, %v2276_v13  }
 0x1f5   : > { %1275 = vperm.xlu0 %2213, %v2278_v32  }
 0x234   : > { %v1136_v26 = vpop.permute.xlu1 %1135 }
 0x235   : > { %v1126_v34 = vpop.permute.xlu0 %1125  ;;  %v1285_v38 = vmul.f32 %v1136_v26, %v1093_v29  ;;  %v1099_v29 = vld [vmem:[#allocation2 + $0x40] sm:$0xff] }
 0x236   : > { %v1283_v14 = vmul.f32 %v1126_v34, %v1091_v1 }
 0x239   : > { %v1141_v40 = vpop.permute.xlu1 %1140 }
 0x23a   : > { %v1286_v21 = vmul.f32 %v1141_v40, %v1094_v15  ;;  %v1100_v15 = vld [vmem:[#allocation2 + $0x48] sm:$0xff] }
 0x23c   : > { %v1131_v47 = vpop.permute.xlu0 %1130 }
 0x23d   : > { %v1151_v7 = vpop.permute.xlu1 %1150  ;;  %v1284_v3 = vmul.f32 %v1131_v47, %v1092_v63  ;;  %v1098_v47 = vld [vmem:[#allocation2 + $0x38] sm:$0xff]  ;;  %v1097_v63 = vld [vmem:[#allocation2 + $0x30] sm:$0xff] }
 0x23e   : > { %v1288_v13 = vmul.f32 %v1151_v7, %v1096_v39  ;;  %v1113_v7 = vld [vmem:[#allocation2 + $0xb0] sm:$0xff]  ;;  %v1118_v39 = vld [vmem:[#allocation2 + $0xd8] sm:$0xff] }
 0x240   : > { %v3229_v20 = vpop.permute.xlu0 %1145 }
 0x241   : > { %v3231_v18 = vpop.permute.xlu1 %1160  ;;  %v1287_v40 = vmul.f32 %v3229_v20, %v1095_v19 }
 0x242   : > { %v1290_v20 = vmul.f32 %v3231_v18, %v1098_v47  ;;  %v1119_v47 = vld [vmem:[#allocation2 + $0xe0] sm:$0xff] }
 0x244   : > { %v3233_v30 = vpop.permute.xlu0 %1155 }
 0x246   : > { %v3235_v31 = vpop.permute.xlu1 %1170 }
 0x248   : > { %v3237_v41 = vpop.permute.xlu0 %1165 }
 0x24a   : > { %v3239_v51 = vpop.permute.xlu1 %1180 }
 0x24c   : > { %v3241_v28 = vpop.permute.xlu0 %1175 }
 0x24e   : > { %v3243_v6 = vpop.permute.xlu1 %1190 }
 0x250   : > { %v3245_v60 = vpop.permute.xlu0 %1185 }
 0x252   : > { %v3247_v23 = vpop.permute.xlu1 %1200 }
 0x254   : > { %v3249_v33 = vpop.permute.xlu0 %1195 }
 0x256   : > { %v1211_v44 = vpop.permute.xlu1 %1210 }
 0x257   : > { %v1300_v10 = vmul.f32 %v1211_v44, %v1108_v0 }
 0x258   : > { %v1206_v45 = vpop.permute.xlu0 %1205 }
 0x259   : > { %v1299_v17 = vmul.f32 %v1206_v45, %v1107_v2  ;;  %v1114_v45 = vld [vmem:[#allocation2 + $0xb8] sm:$0xff] }
 0x25a   : > { %v1221_v52 = vpop.permute.xlu1 %1220 }
 0x25b   : > { %v1302_v22 = vmul.f32 %v1221_v52, %v1110_v24  ;;  %v1116_v24 = vld [vmem:[#allocation2 + $0xc8] sm:$0xff] }
 0x25c   : > { %v1216_v53 = vpop.permute.xlu0 %1215 }
 0x25d   : > { %v1301_v4 = vmul.f32 %v1216_v53, %v1109_v35  ;;  %v1115_v35 = vld [vmem:[#allocation2 + $0xc0] sm:$0xff] }
 0x25e   : > { %v1231_v54 = vpop.permute.xlu1 %1230 }
 0x25f   : > { %v1304_v32 = vmul.f32 %v1231_v54, %v1112_v59 }
 0x260   : > { %v1226_v55 = vpop.permute.xlu0 %1225 }
 0x261   : > { %v1303_v44 = vmul.f32 %v1226_v55, %v1111_v36 }
 0x262   : > { %v3251_v56 = vpop.permute.xlu1 %1240 }
 0x263   : > { %v1306_v55 = vmul.f32 %v3251_v56, %v1114_v45 }
 0x264   : > { %v3253_v62 = vpop.permute.xlu0 %1235 }
 0x266   : > { %v3255_v11 = vpop.permute.xlu1 %1250 }
 0x268   : > { %v3257_v12 = vpop.permute.xlu0 %1245 }
 0x26a   : > { %v3263_v26 = vpop.permute.xlu1 %1260 }
 0x26c   : > { %v3265_v34 = vpop.permute.xlu0 %1255 }
 0x282   : > { %v1965_v25 = vpop.f32.mrb[0].mxu0  ;;  %v1989_v27 = vpop.f32.mrb[0].mxu1 }
 0x283   : > { %v1674_v48 = vadd.f32 %v1965_v25, %v1284_v3  ;;  %v1690_v49 = vadd.f32 %v1989_v27, %v1300_v10  ;;  %v1514_v50 = vpop.f32.mrb[1].mxu0  ;;  %v1594_v57 = vpop.f32.mrb[1].mxu1 }
 0x284   : > { %v1673_v58 = vadd.f32 %v1514_v50, %v1283_v14  ;;  %v1689_v5 = vadd.f32 %v1594_v57, %v1299_v17  ;;  %v1289_v14 = vmul.f32 %v3233_v30, %v1097_v63  ;;  %v1305_v17 = vmul.f32 %v3253_v62, %v1113_v7 }
 0x285   : > { %1706 = vst [vmem:[%s2637_s18 + $0x8] sm:$0xff] %v1674_v48  ;;  %1722 = vst [vmem:[%s2637_s18 + $0x88] sm:$0xff] %v1690_v49  ;;  %v1292_v57 = vmul.f32 %v3235_v31, %v1100_v15  ;;  %v1308_v62 = vmul.f32 %v3255_v11, %v1116_v24  ;;  %v1117_v31 = vld [vmem:[#allocation2 + $0xd0] sm:$0xff] }
 0x286   : > { %1705 = vst [vmem:[%s2637_s18] sm:$0xff] %v1673_v58  ;;  %1721 = vst [vmem:[%s2637_s18 + $0x80] sm:$0xff] %v1689_v5  ;;  %v1968_v61 = vpop.f32.mrb[2].mxu0  ;;  %v1992_v16 = vpop.f32.mrb[2].mxu1 }
 0x287   : > { %v1676_v42 = vadd.f32 %v1968_v61, %v1286_v21  ;;  %v1692_v43 = vadd.f32 %v1992_v16, %v1302_v22  ;;  %v1524_v9 = vpop.f32.mrb[3].mxu0  ;;  %v1604_v37 = vpop.f32.mrb[3].mxu1  ;;  %v1291_v21 = vmul.f32 %v3237_v41, %v1099_v29  ;;  %v1102_v22 = vld [vmem:[#allocation2 + $0x58] sm:$0xff]  ;;  %v1101_v61 = vld [vmem:[#allocation2 + $0x50] sm:$0xff] }
 0x288   : > { %v1675_v8 = vadd.f32 %v1524_v9, %v1285_v38  ;;  %v1691_v46 = vadd.f32 %v1604_v37, %v1301_v4  ;;  %v1271_v58 = vpop.permute.xlu1 %1270  ;;  %v1266_v5 = vpop.permute.xlu0 %1265  ;;  %v1307_v38 = vmul.f32 %v3257_v12, %v1115_v35  ;;  %v1310_v12 = vmul.f32 %v3263_v26, %v1118_v39  ;;  %v1104_v37 = vld [vmem:[#allocation2 + $0x68] sm:$0xff] }
 0x289   : > { %1708 = vst [vmem:[%s2637_s18 + $0x18] sm:$0xff] %v1676_v42  ;;  %1724 = vst [vmem:[%s2637_s18 + $0x98] sm:$0xff] %v1692_v43  ;;  %v1294_v43 = vmul.f32 %v3239_v51, %v1102_v22  ;;  %v1293_v9 = vmul.f32 %v3241_v28, %v1101_v61 }
 0x28a   : > { %1707 = vst [vmem:[%s2637_s18 + $0x10] sm:$0xff] %v1675_v8  ;;  %1723 = vst [vmem:[%s2637_s18 + $0x90] sm:$0xff] %v1691_v46  ;;  %v1971_v52 = vpop.f32.mrb[4].mxu0  ;;  %v1995_v53 = vpop.f32.mrb[4].mxu1  ;;  %v1309_v8 = vmul.f32 %v3265_v34, %v1117_v31  ;;  %v1120_v46 = vld [vmem:[#allocation2 + $0xe8] sm:$0xff] }
 0x28b   : > { %v1678_v54 = vadd.f32 %v1971_v52, %v1288_v13  ;;  %v1694_v0 = vadd.f32 %v1995_v53, %v1304_v32  ;;  %v1534_v1 = vpop.f32.mrb[5].mxu0  ;;  %v1614_v2 = vpop.f32.mrb[5].mxu1  ;;  %v1296_v53 = vmul.f32 %v3243_v6, %v1104_v37  ;;  %v1312_v34 = vmul.f32 %v1271_v58, %v1120_v46  ;;  %v1121_v6 = vld [vmem:[#allocation2 + $0xf0] sm:$0xff] }
 0x28c   : > { %v1677_v3 = vadd.f32 %v1534_v1, %v1287_v40  ;;  %v1693_v10 = vadd.f32 %v1614_v2, %v1303_v44  ;;  %v1103_v40 = vld [vmem:[#allocation2 + $0x60] sm:$0xff]  ;;  %v1281_v63 = vpop.permute.xlu1 %1280  ;;  %v1276_v7 = vpop.permute.xlu0 %1275  ;;  %v1311_v1 = vmul.f32 %v1266_v5, %v1119_v47  ;;  %v1122_v2 = vld [vmem:[#allocation2 + $0xf8] sm:$0xff] }
 0x28d   : > { %1710 = vst [vmem:[%s2637_s18 + $0x28] sm:$0xff] %v1678_v54  ;;  %1726 = vst [vmem:[%s2637_s18 + $0xa8] sm:$0xff] %v1694_v0  ;;  %v1295_v54 = vmul.f32 %v3245_v60, %v1103_v40  ;;  %v1106_v0 = vld [vmem:[#allocation2 + $0x78] sm:$0xff]  ;;  %v1313_v35 = vmul.f32 %v1276_v7, %v1121_v6 }
 0x28e   : > { %1709 = vst [vmem:[%s2637_s18 + $0x20] sm:$0xff] %v1677_v3  ;;  %1725 = vst [vmem:[%s2637_s18 + $0xa0] sm:$0xff] %v1693_v10  ;;  %v1974_v25 = vpop.f32.mrb[6].mxu0  ;;  %v1298_v60 = vmul.f32 %v3247_v23, %v1106_v0 }
 0x28f   : > { %v1998_v27 = vpop.f32.mrb[6].mxu1  ;;  %v1680_v48 = vadd.f32 %v1974_v25, %v1290_v20  ;;  %v1544_v56 = vpop.f32.mrb[7].mxu0  ;;  %v1105_v20 = vld [vmem:[#allocation2 + $0x70] sm:$0xff] }
 0x290   : > { %v1696_v18 = vadd.f32 %v1998_v27, %v1306_v55  ;;  %v1624_v49 = vpop.f32.mrb[7].mxu1  ;;  %v1679_v50 = vadd.f32 %v1544_v56, %v1289_v14  ;;  %v1314_v27 = vmul.f32 %v1281_v63, %v1122_v2  ;;  %v1297_v29 = vmul.f32 %v3249_v33, %v1105_v20 }
 0x291   : > { %v1695_v30 = vadd.f32 %v1624_v49, %v1305_v17  ;;  %1712 = vst [vmem:[%s2637_s18 + $0x38] sm:$0xff] %v1680_v48 }
 0x292   : > { %1728 = vst [vmem:[%s2637_s18 + $0xb8] sm:$0xff] %v1696_v18  ;;  %1711 = vst [vmem:[%s2637_s18 + $0x30] sm:$0xff] %v1679_v50 }
 0x293   : > { %1727 = vst [vmem:[%s2637_s18 + $0xb0] sm:$0xff] %v1695_v30  ;;  %v1977_v4 = vpop.f32.mrb[8].mxu0 }
 0x294   : > { %v2001_v59 = vpop.f32.mrb[8].mxu1  ;;  %v1682_v11 = vadd.f32 %v1977_v4, %v1292_v57  ;;  %v1554_v19 = vpop.f32.mrb[9].mxu0 }
 0x295   : > { %v1698_v16 = vadd.f32 %v2001_v59, %v1308_v62  ;;  %v1634_v36 = vpop.f32.mrb[9].mxu1  ;;  %v1681_v42 = vadd.f32 %v1554_v19, %v1291_v21 }
 0x296   : > { %v1697_v41 = vadd.f32 %v1634_v36, %v1307_v38  ;;  %1714 = vst [vmem:[%s2637_s18 + $0x48] sm:$0xff] %v1682_v11 }
 0x297   : > { %1730 = vst [vmem:[%s2637_s18 + $0xc8] sm:$0xff] %v1698_v16  ;;  %1713 = vst [vmem:[%s2637_s18 + $0x40] sm:$0xff] %v1681_v42  ;;  %v1980_v13 = vpop.f32.mrb[10].mxu0 }
 0x298   : > { %1729 = vst [vmem:[%s2637_s18 + $0xc0] sm:$0xff] %v1697_v41  ;;  %v2004_v32 = vpop.f32.mrb[10].mxu1  ;;  %v1684_v44 = vadd.f32 %v1980_v13, %v1294_v43  ;;  %v1564_v26 = vpop.f32.mrb[11].mxu0 }
 0x299   : > { %v1700_v51 = vadd.f32 %v2004_v32, %v1310_v12  ;;  %v1644_v45 = vpop.f32.mrb[11].mxu1  ;;  %v1683_v52 = vadd.f32 %v1564_v26, %v1293_v9 }
 0x29a   : > { %v1699_v28 = vadd.f32 %v1644_v45, %v1309_v8  ;;  %1716 = vst [vmem:[%s2637_s18 + $0x58] sm:$0xff] %v1684_v44 }
 0x29b   : > { %1732 = vst [vmem:[%s2637_s18 + $0xd8] sm:$0xff] %v1700_v51  ;;  %1715 = vst [vmem:[%s2637_s18 + $0x50] sm:$0xff] %v1683_v52  ;;  %v1983_v3 = vpop.f32.mrb[12].mxu0 }
 0x29c   : > { %1731 = vst [vmem:[%s2637_s18 + $0xd0] sm:$0xff] %v1699_v28  ;;  %v2007_v10 = vpop.f32.mrb[12].mxu1  ;;  %v1686_v55 = vadd.f32 %v1983_v3, %v1296_v53  ;;  %v1574_v15 = vpop.f32.mrb[13].mxu0 }
 0x29d   : > { %v1702_v14 = vadd.f32 %v2007_v10, %v1312_v34  ;;  %v1654_v17 = vpop.f32.mrb[13].mxu1  ;;  %v1685_v24 = vadd.f32 %v1574_v15, %v1295_v54 }
 0x29e   : > { %v1701_v25 = vadd.f32 %v1654_v17, %v1311_v1  ;;  %1718 = vst [vmem:[%s2637_s18 + $0x68] sm:$0xff] %v1686_v55 }
 0x29f   : > { %1734 = vst [vmem:[%s2637_s18 + $0xe8] sm:$0xff] %v1702_v14  ;;  %1717 = vst [vmem:[%s2637_s18 + $0x60] sm:$0xff] %v1685_v24  ;;  %v1986_v48 = vpop.f32.mrb[14].mxu0 }
 0x2a0   : > { %1733 = vst [vmem:[%s2637_s18 + $0xe0] sm:$0xff] %v1701_v25  ;;  %v2010_v18 = vpop.f32.mrb[14].mxu1  ;;  %v1688_v56 = vadd.f32 %v1986_v48, %v1298_v60  ;;  %v1584_v50 = vpop.f32.mrb[15].mxu0 }
 0x2a1   : > { %v1704_v49 = vadd.f32 %v2010_v18, %v1314_v27  ;;  %v1664_v30 = vpop.f32.mrb[15].mxu1  ;;  %v1687_v57 = vadd.f32 %v1584_v50, %v1297_v29 }
 0x2a2   : > { %v1703_v23 = vadd.f32 %v1664_v30, %v1313_v35  ;;  %1720 = vst [vmem:[%s2637_s18 + $0x78] sm:$0xff] %v1688_v56 }
 0x2a3   : > { %1736 = vst [vmem:[%s2637_s18 + $0xf8] sm:$0xff] %v1704_v49  ;;  %1719 = vst [vmem:[%s2637_s18 + $0x70] sm:$0xff] %v1687_v57 }
 0x2a4   : > { %1735 = vst [vmem:[%s2637_s18 + $0xf0] sm:$0xff] %v1703_v23 }
 0x2a5 PF: > { %s1918_s21 = sshll.u32 %s2419_s22, 12  ;;  %s1751_s10 = sshll.u32 %s2637_s18, 4  ;;  %s3319_s10 = int_to_ptr.vmem [resolvable:$true] %s1751_s10 }
 0x2a6   : > { %s3316_s9 = scalar_lea.hbm %s3388_s4, %s1918_s21  ;;  %s3323_s7 = scalar_lea.sflag [#allocation6], %s262_s20 }
 0x2a7   : > { %s2309_s29 = scalar_lea.vmem %s3319_s10, 4096  ;;  %p3421_p1 = scmp.ne.s32.totalorder %s3407_s11, 0 }
 0x2a8   : > { %p2310_p0 = scmp.ne.s32.totalorder %s3319_s10, %s2309_s29  ;;  %s2440_s22 = smov [#allocation7]  }
 0x2a9   : > { %s2313_s30 = sshll.u32 %s2440_s22, 4  ;;  %s2314_s30 = int_to_ptr.vmem [resolvable:$false] %s2313_s30 }
 0x2aa   : > { %p2311_p6 = pnand %p2310_p0, %p3421_p1  ;;  %s2315_s26 = scalar_lea.vmem %s2314_s30, 8192 }
 0x2ab   : > { %p2316_p10 = scmp.lt.s32.totalorder %s3319_s10, %s2314_s30  ;;  %p2317_p11 = scmp.lt.s32.totalorder %s2315_s26, %s2309_s29 }
 0x2ac   : > { %p2312_p8 = pneg %p2311_p6 }
 0x2ad   : > { %p2318_p13 = por %p2317_p11, %p2316_p10 }
 0x2af   : > { %p2319_p5 = pnand %p2318_p13, %p2312_p8 }
 0x2b1   : > { %2322 = shalt.err (!%p2319_p5)
}
 0x2b2   : > { %s2323_s20 = scalar_lea.hbm %s3316_s9, 4096  ;;  %s2327_s6 = scalar_lea.hbm %s3388_s4, 8192 }
 0x2b3   : > { %p2324_p3 = scmp.ne.s32.totalorder %s3316_s9, %s2323_s20  ;;  %p2328_p2 = scmp.lt.u32.totalorder %s3316_s9, %s3388_s4 }
 0x2b4   : > { %p2329_p7 = scmp.lt.u32.totalorder %s2327_s6, %s2323_s20  ;;  %p2331_p0 = scmp.lt.u32.totalorder %s2323_s20, %s3316_s9 }
 0x2b5   : > { %p2325_p9 = pnand %p2324_p3, %p3421_p1 }
 0x2b6   : > { %p2330_p4 = por %p2329_p7, %p2328_p2 }
 0x2b7   : > { %p2326_p12 = pneg %p2325_p9 }
 0x2b8   : > { %p2332_p6 = por %p2331_p0, %p2330_p4 }
 0x2ba   : > { %p2333_p8 = pnand %p2332_p6, %p2326_p12 }
 0x2bc   : > { %2336 = shalt.err (!%p2333_p8)
}
 0x2bd   : > { %s2441_s21 = smov 128   ;;  %s2442_s13 = smov 8  }
 0x2be   : > { %2105 = dma.vmem_to_hbm [thread:$0]  (%p3421_p1), %s3319_s10, 4096, %s3316_s9, %s3323_s7, %s2441_s21, %s2441_s21, %s2442_s13  }
 0x2bf PF: > { %p2116_p10 = scmp.ge.s32.totalorder %s2431_s25, 2  ;;  %s1766_s5 = sand.u32 1, %s2391_s15  }
 0x2c0   : > { %p3422_p11 = scmp.ne.s32.totalorder %s3409_s14, 0  ;;  %s1767_s29 = scalar_lea.sflag [#allocation6], %s1766_s5 }
 0x2c2   : > { %p2112_p13 = pnand %p2116_p10, %p3422_p11 }
 0x2c4   : > { %2386 = dma.done.wait (!%p2112_p13), %s1767_s29, 4096  }
 0x2c5   : > { %2388 = vsyncadd (!%p2112_p13), %s1767_s29, 4294963200  ;;  %s20_s25 = sadd.s32 1, %s2431_s25   ;;  %s3423_s11 = sld [smem:[#allocation10_spill]] }
 0x2c6   : > { %p17_p5 = scmp.ge.s32.totalorder %s20_s25, 6   ;;  %s3424_s20 = sld [smem:[#allocation13_spill]] }
 0x2c7   : > { %s3425_s9 = sld [smem:[#allocation11_spill]]  ;;  %s3426_s10 = sld [smem:[#allocation12_spill]] }
 0x2c8   : > { %s3427_s15 = smov %s2395_s16  ;;  %s3428_s16 = smov %s2399_s17 }
 0x2c9   : > { %s3429_s17 = smov %s2555_s12  ;;  %s3430_s18 = smov %s2407_s19 }
 0x2ca   : > { %s3432_s21 = smov %s2423_s23  ;;  %s3433_s22 = smov %s2427_s24 }
 0x2cb   : > { %s3431_s19 = smov %s3423_s11  ;;  %19 = sbr.rel (!%p17_p5) target bundleno = 9 (0x9), region = 95 }
 0x2cd   : > { %s3434_s23 = smov %s3425_s9  ;;  %s3435_s24 = smov %s3426_s10 }
 0x2d2   :  { %1772 = vsyncpa [#allocation5], 1 }
 0x2d3   :  { %1774 = vsyncpa [#allocation5 + $0x1], 1 }
 0x2d4   :  { %1775 = vsyncpa [#allocation6], 1 }
 0x2d5   :  { %1777 = vsyncpa [#allocation6 + $0x1], 1 }

</bundles_post_ra>
